<compile_context>
chip_gen: v6e
topology: v6e:2x2x1
jax: 0.10.0
libtpu: 0.0.40
codegen_flags: <defaults>
</compile_context>

<pallas_src>
import functools
import math

import jax
import jax.numpy as jnp
from jax.experimental import pallas as pl
from jax.experimental.pallas import tpu as pltpu

# ----------------------------- config ---------------------------------------
EMB = 32
HEADS = 2
HEAD_DIM = EMB // HEADS
FWD_EXP = 4
HID = FWD_EXP * EMB                       # 128
LN_EPS = 1e-5
NEG_INF = -1e20
INV_SCALE = 1.0 / math.sqrt(HEAD_DIM)     # PyTorch divides energy by sqrt(head_dim)


# ----------------------------- kernel ----------------------------------------
def _decoder_block_kernel(x_ref, value_ref, key_ref, trg_mask_ref, src_mask_ref,
                          wmat_ref, wmisc_ref, out_ref, attn_ref,
                          *, n, lt, ls, emb, heads, hid, inv_scale, eps):
    """Whole DecoderBlock for the full batch; every intermediate stays in VMEM."""
    E, H = emb, heads
    Dh = E // H

    W = wmat_ref[...]        # (E, 12E) packed matmul weights
    M = wmisc_ref[...]       # (16+HID, HID) packed vectors + FFN-2 weight

    # Static slices of the packed weight slabs (zero-cost views of VMEM values).
    wqkv = W[:, 0:3 * E]             # fused self-attn Q|K|V   (E, 3E)
    wo_d = W[:, 3 * E:4 * E]         # self-attn out proj      (E, E)
    wq_x = W[:, 4 * E:5 * E]         # cross-attn Q            (E, E)
    wk_x = W[:, 5 * E:6 * E]         # cross-attn K            (E, E)
    wv_x = W[:, 6 * E:7 * E]         # cross-attn V            (E, E)
    wo_x = W[:, 7 * E:8 * E]         # cross-attn out proj     (E, E)
    w1t = W[:, 8 * E:8 * E + hid]    # FFN first layer         (E, HID)

    bo_d, g_d, b_d = M[0:1, :E], M[1:2, :E], M[2:3, :E]
    bo_x, g1, b1 = M[3:4, :E], M[4:5, :E], M[5:6, :E]
    bb2, g2, b2 = M[6:7, :E], M[7:8, :E], M[8:9, :E]
    bb1 = M[9:10, :hid]              # (1, HID)
    w2t = M[16:16 + hid, :E]         # FFN second layer        (HID, E)

    def rows(a):
        # (B, L, E) -> (B*L, E) by sublane concatenation (layout-trivial, no
        # reshape of the minor dims).
        return jnp.concatenate([a[i] for i in range(a.shape[0])], axis=0)

    x2d = rows(x_ref[...].astype(jnp.float32))        # (n*lt, E)
    vsrc = rows(value_ref[...].astype(jnp.float32))   # (n*ls, E)
    ksrc = rows(key_ref[...].astype(jnp.float32))     # (n*ls, E)
    trg_mask = trg_mask_ref[...]                      # (n, lt, lt)
    src_mask = src_mask_ref[...]                      # (n, lt, ls)

    def layer_norm(v, g, b):
        mu = jnp.mean(v, axis=-1, keepdims=True)
        var = jnp.mean(jnp.square(v - mu), axis=-1, keepdims=True)
        return (v - mu) * jax.lax.rsqrt(var + eps) * g + b

    def mha(q2d, k2d, v2d, mask, lq, lk):
        # q2d: (n*lq, E), k2d/v2d: (n*lk, E), mask: (n, lq, lk).
        # Build a (n*H, L, Dh) head-batched view via static slices + stack.
        def heads_of(t2d, l):
            return jnp.stack(
                [t2d[b * l:(b + 1) * l, h * Dh:(h + 1) * Dh]
                 for b in range(n) for h in range(H)], axis=0)

        qh, kh, vh = heads_of(q2d, lq), heads_of(k2d, lk), heads_of(v2d, lk)
        mh = jnp.stack([mask[b] for b in range(n) for _ in range(H)], axis=0)

        e = jnp.einsum('bqd,bkd->bqk', qh, kh,
                       preferred_element_type=jnp.float32) * inv_scale
        e = jnp.where(mh == 0.0, NEG_INF, e)
        p = jnp.exp(e - jnp.max(e, axis=-1, keepdims=True))
        a = p * pl.reciprocal(jnp.sum(p, axis=-1, keepdims=True), approx=True)

        ctx = jnp.einsum('bqk,bkd->bqd', a, vh,
                         preferred_element_type=jnp.float32)     # (n*H, lq, Dh)
        # (n*H, lq, Dh) -> (n*lq, H*Dh): heads concat along lanes, batches
        # along sublanes; the output projection is then ONE 2D matmul.
        ctx2d = jnp.concatenate(
            [jnp.concatenate([ctx[b * H + h] for h in range(H)], axis=1)
             for b in range(n)], axis=0)
        return ctx2d, a

    # 1) masked self-attention on x (attention weights are discarded, never stored)
    qkv = jnp.dot(x2d, wqkv, preferred_element_type=jnp.float32)   # (n*lt, 3E)
    ctx1, _ = mha(qkv[:, 0:E], qkv[:, E:2 * E], qkv[:, 2 * E:3 * E],
                  trg_mask, lt, lt)
    out1 = jnp.dot(ctx1, wo_d, preferred_element_type=jnp.float32) + bo_d

    # 2) query = Dropout(LayerNorm(out1 + x))   (dropout = identity, eval mode)
    # TODO(synk): training-mode RNG dropout not implemented (eval/identity only).
    query = layer_norm(out1 + x2d, g_d, b_d)

    # 3) TransformerBlock cross-attention (value, key, query, src_mask)
    q2 = jnp.dot(query, wq_x, preferred_element_type=jnp.float32)
    k2 = jnp.dot(ksrc, wk_x, preferred_element_type=jnp.float32)
    v2 = jnp.dot(vsrc, wv_x, preferred_element_type=jnp.float32)
    ctx2, attn2 = mha(q2, k2, v2, src_mask, lt, ls)
    out2 = jnp.dot(ctx2, wo_x, preferred_element_type=jnp.float32) + bo_x

    # 4) tail: x3 = LN1(out2 + query); FFN; LN2(ffn + x3)   (dropouts identity)
    x3 = layer_norm(out2 + query, g1, b1)
    hdn = jnp.maximum(
        jnp.dot(x3, w1t, preferred_element_type=jnp.float32) + bb1, 0.0)
    ffn = jnp.dot(hdn, w2t, preferred_element_type=jnp.float32) + bb2
    out = layer_norm(ffn + x3, g2, b2)

    for b in range(n):   # aligned sublane-slab stores per batch element
        out_ref[b] = out[b * lt:(b + 1) * lt, :].astype(out_ref.dtype)
    # leading-dims-only reshape (n*H, lt, ls) -> (n, H, lt, ls): layout-trivial
    attn_ref[...] = attn2.reshape(n, H, lt, ls).astype(attn_ref.dtype)


# ----------------------------- wrapper ----------------------------------------
def _full_spec(shape):
    """Whole-array block; constant index map for the singleton grid."""
    nd = len(shape)
    return pl.BlockSpec(tuple(shape), lambda i, _z=(0,) * nd: _z)


def decoder_block_forward(x, value, key, src_mask, trg_mask, params):
    N, Lt, E = x.shape
    Ls = key.shape[1]

    kernel = functools.partial(
        _decoder_block_kernel, n=N, lt=Lt, ls=Ls, emb=E, heads=HEADS,
        hid=HID, inv_scale=INV_SCALE, eps=LN_EPS)

    out, attn = pl.pallas_call(
        kernel,
        out_shape=(jax.ShapeDtypeStruct((N, Lt, E), jnp.float32),
                   jax.ShapeDtypeStruct((N, HEADS, Lt, Ls), jnp.float32)),
        grid=(1,),                      # single step: whole batch in one shot
        in_specs=[
            _full_spec((N, Lt, E)),                 # x
            _full_spec((N, Ls, E)),                 # value
            _full_spec((N, Ls, E)),                 # key
            _full_spec((N, Lt, Lt)),                # trg_mask
            _full_spec((N, Lt, Ls)),                # src_mask
            _full_spec(params["wmat"].shape),       # packed (E, 12E) weights
            _full_spec(params["wmisc"].shape),      # packed vectors + FFN-2 w
        ],
        out_specs=(_full_spec((N, Lt, E)),
                   _full_spec((N, HEADS, Lt, Ls))),
        compiler_params=pltpu.CompilerParams(
            dimension_semantics=("arbitrary",)),
    )(x, value, key, trg_mask, src_mask, params["wmat"], params["wmisc"])
    return out, attn


# ----------------------------- params -----------------------------------------
def init_params(rng):
    def nrm(k, shape, scale=0.02):
        return (scale * jax.random.normal(k, shape)).astype(jnp.float32)

    ks = jax.random.split(rng, 14)
    wq_d, wk_d, wv_d, wo_d = (nrm(ks[i], (EMB, EMB)) for i in range(4))
    wq_x, wk_x, wv_x, wo_x = (nrm(ks[i], (EMB, EMB)) for i in range(4, 8))
    bo_d = nrm(ks[8], (EMB,))
    bo_x = nrm(ks[9], (EMB,))
    w1 = nrm(ks[10], (HID, EMB))
    bb1 = nrm(ks[11], (HID,))
    w2 = nrm(ks[12], (EMB, HID))
    bb2 = nrm(ks[13], (EMB,))

    # One (E, 12E) slab of every (E, X) matmul operand, pre-transposed so the
    # kernel only ever does x @ W (nn.Linear: y = x @ W.T + b).
    wmat = jnp.concatenate(
        [wq_d.T, wk_d.T, wv_d.T,     # fused self-attn QKV (E, 3E)
         wo_d.T,                     # self-attn out proj  (E, E)
         wq_x.T, wk_x.T, wv_x.T,     # cross-attn Q/K/V    (E, 3E)
         wo_x.T,                     # cross-attn out proj (E, E)
         w1.T],                      # FFN first layer     (E, HID)
        axis=1)                      # -> (32, 384)

    # One (16+HID, HID) slab: rows 0..9 hold biases / LayerNorm params
    # (E-wide ones in [:, :EMB], bb1 full-width in row 9); rows 16.. hold the
    # FFN second-layer weight (HID, E).
    ones_e = jnp.ones((EMB,), jnp.float32)
    zeros_e = jnp.zeros((EMB,), jnp.float32)
    misc = jnp.zeros((16 + HID, HID), jnp.float32)
    vec_rows = [bo_d, ones_e, zeros_e,      # self-attn out bias, dec LN g/b
                bo_x, ones_e, zeros_e,      # cross-attn out bias, LN1 g/b
                bb2, ones_e, zeros_e]       # FFN-2 bias, LN2 g/b
    for r, v in enumerate(vec_rows):
        misc = misc.at[r, :EMB].set(v)
    misc = misc.at[9, :HID].set(bb1)
    misc = misc.at[16:16 + HID, :EMB].set(w2.T)

    return {"wmat": wmat, "wmisc": misc}


# ----------------------------- main -------------------------------------------
if __name__ == "__main__":
    N, Lt, Ls = 2, 8, 8
    root = jax.random.PRNGKey(0)
    k_par, k_x, k_v, k_k = jax.random.split(root, 4)

    params = init_params(k_par)
    x = jax.random.normal(k_x, (N, Lt, EMB), jnp.float32)
    value = jax.random.normal(k_v, (N, Ls, EMB), jnp.float32)
    key = jax.random.normal(k_k, (N, Ls, EMB), jnp.float32)

    # causal target mask, full source mask (1 = keep, 0 = mask out)
    trg_mask = jnp.broadcast_to(
        jnp.tril(jnp.ones((Lt, Lt), jnp.float32)), (N, Lt, Lt))
    src_mask = jnp.ones((N, Lt, Ls), jnp.float32)

    output, attention = jax.jit(decoder_block_forward)(
        x, value, key, src_mask, trg_mask, params)
    jax.block_until_ready((output, attention))

    assert output.shape == (N, Lt, EMB)
    assert attention.shape == (N, HEADS, Lt, Ls)
    assert bool(jnp.all(jnp.isfinite(output)))
    assert bool(jnp.all(jnp.isfinite(attention)))
    print("KERNEL_OK")
</pallas_src>

<mosaic_0001>
module attributes {stable_mosaic.version = 11 : i64} {
  func.func @_decoder_block_kernel(%arg0: i32, %arg1: memref<2x8x32xf32, #tpu.memory_space<vmem>>, %arg2: memref<2x8x32xf32, #tpu.memory_space<vmem>>, %arg3: memref<2x8x32xf32, #tpu.memory_space<vmem>>, %arg4: memref<2x8x8xf32, #tpu.memory_space<vmem>>, %arg5: memref<2x8x8xf32, #tpu.memory_space<vmem>>, %arg6: memref<32x384xf32, #tpu.memory_space<vmem>>, %arg7: memref<144x128xf32, #tpu.memory_space<vmem>>, %arg8: memref<2x8x32xf32, #tpu.memory_space<vmem>>, %arg9: memref<2x2x8x8xf32, #tpu.memory_space<vmem>>) attributes {dimension_semantics = [#tpu.dimension_semantics<arbitrary>], iteration_bounds = array<i64: 1>, scalar_prefetch = 0 : i64, scratch_operands = 0 : i64, tpu.core_type = #tpu.core_type<tc>, window_params = [{pipeline_mode = #tpu.pipeline_mode<synchronous>, transform_indices = @transform_0, window_bounds = array<i64: 2, 8, 32>}, {pipeline_mode = #tpu.pipeline_mode<synchronous>, transform_indices = @transform_1, window_bounds = array<i64: 2, 8, 32>}, {pipeline_mode = #tpu.pipeline_mode<synchronous>, transform_indices = @transform_2, window_bounds = array<i64: 2, 8, 32>}, {pipeline_mode = #tpu.pipeline_mode<synchronous>, transform_indices = @transform_3, window_bounds = array<i64: 2, 8, 8>}, {pipeline_mode = #tpu.pipeline_mode<synchronous>, transform_indices = @transform_4, window_bounds = array<i64: 2, 8, 8>}, {pipeline_mode = #tpu.pipeline_mode<synchronous>, transform_indices = @transform_5, window_bounds = array<i64: 32, 384>}, {pipeline_mode = #tpu.pipeline_mode<synchronous>, transform_indices = @transform_6, window_bounds = array<i64: 144, 128>}, {pipeline_mode = #tpu.pipeline_mode<synchronous>, transform_indices = @transform_7, window_bounds = array<i64: 2, 8, 32>}, {pipeline_mode = #tpu.pipeline_mode<synchronous>, transform_indices = @transform_8, window_bounds = array<i64: 2, 2, 8, 8>}]} {
    %c0 = arith.constant 0 : index
    %c0_0 = arith.constant 0 : index
    %0 = vector.load %arg6[%c0, %c0_0] : memref<32x384xf32, #tpu.memory_space<vmem>>, vector<32x384xf32>
    %c0_1 = arith.constant 0 : index
    %c0_2 = arith.constant 0 : index
    %1 = vector.load %arg7[%c0_1, %c0_2] : memref<144x128xf32, #tpu.memory_space<vmem>>, vector<144x128xf32>
    %2 = vector.extract_strided_slice %0 {offsets = [0, 0], sizes = [32, 96], strides = [1, 1]} : vector<32x384xf32> to vector<32x96xf32>
    %3 = vector.extract_strided_slice %0 {offsets = [0, 96], sizes = [32, 32], strides = [1, 1]} : vector<32x384xf32> to vector<32x32xf32>
    %4 = vector.extract_strided_slice %0 {offsets = [0, 128], sizes = [32, 32], strides = [1, 1]} : vector<32x384xf32> to vector<32x32xf32>
    %5 = vector.extract_strided_slice %0 {offsets = [0, 160], sizes = [32, 32], strides = [1, 1]} : vector<32x384xf32> to vector<32x32xf32>
    %6 = vector.extract_strided_slice %0 {offsets = [0, 192], sizes = [32, 32], strides = [1, 1]} : vector<32x384xf32> to vector<32x32xf32>
    %7 = vector.extract_strided_slice %0 {offsets = [0, 224], sizes = [32, 32], strides = [1, 1]} : vector<32x384xf32> to vector<32x32xf32>
    %8 = vector.extract_strided_slice %0 {offsets = [0, 256], sizes = [32, 128], strides = [1, 1]} : vector<32x384xf32> to vector<32x128xf32>
    %9 = vector.extract_strided_slice %1 {offsets = [0, 0], sizes = [1, 32], strides = [1, 1]} : vector<144x128xf32> to vector<1x32xf32>
    %10 = vector.extract_strided_slice %1 {offsets = [1, 0], sizes = [1, 32], strides = [1, 1]} : vector<144x128xf32> to vector<1x32xf32>
    %11 = vector.extract_strided_slice %1 {offsets = [2, 0], sizes = [1, 32], strides = [1, 1]} : vector<144x128xf32> to vector<1x32xf32>
    %12 = vector.extract_strided_slice %1 {offsets = [3, 0], sizes = [1, 32], strides = [1, 1]} : vector<144x128xf32> to vector<1x32xf32>
    %13 = vector.extract_strided_slice %1 {offsets = [4, 0], sizes = [1, 32], strides = [1, 1]} : vector<144x128xf32> to vector<1x32xf32>
    %14 = vector.extract_strided_slice %1 {offsets = [5, 0], sizes = [1, 32], strides = [1, 1]} : vector<144x128xf32> to vector<1x32xf32>
    %15 = vector.extract_strided_slice %1 {offsets = [6, 0], sizes = [1, 32], strides = [1, 1]} : vector<144x128xf32> to vector<1x32xf32>
    %16 = vector.extract_strided_slice %1 {offsets = [7, 0], sizes = [1, 32], strides = [1, 1]} : vector<144x128xf32> to vector<1x32xf32>
    %17 = vector.extract_strided_slice %1 {offsets = [8, 0], sizes = [1, 32], strides = [1, 1]} : vector<144x128xf32> to vector<1x32xf32>
    %18 = vector.extract_strided_slice %1 {offsets = [9, 0], sizes = [1, 128], strides = [1, 1]} : vector<144x128xf32> to vector<1x128xf32>
    %19 = vector.extract_strided_slice %1 {offsets = [16, 0], sizes = [128, 32], strides = [1, 1]} : vector<144x128xf32> to vector<128x32xf32>
    %c0_3 = arith.constant 0 : index
    %c0_4 = arith.constant 0 : index
    %c0_5 = arith.constant 0 : index
    %20 = vector.load %arg1[%c0_3, %c0_4, %c0_5] : memref<2x8x32xf32, #tpu.memory_space<vmem>>, vector<2x8x32xf32>
    %21 = vector.extract_strided_slice %20 {offsets = [0, 0, 0], sizes = [1, 8, 32], strides = [1, 1, 1]} : vector<2x8x32xf32> to vector<1x8x32xf32>
    %22 = vector.shape_cast %21 : vector<1x8x32xf32> to vector<8x32xf32>
    %23 = vector.extract_strided_slice %20 {offsets = [1, 0, 0], sizes = [1, 8, 32], strides = [1, 1, 1]} : vector<2x8x32xf32> to vector<1x8x32xf32>
    %24 = vector.shape_cast %23 : vector<1x8x32xf32> to vector<8x32xf32>
    %25 = tpu.concatenate %22, %24 in 0 : vector<8x32xf32>, vector<8x32xf32> -> vector<16x32xf32>
    %c0_6 = arith.constant 0 : index
    %c0_7 = arith.constant 0 : index
    %c0_8 = arith.constant 0 : index
    %26 = vector.load %arg2[%c0_6, %c0_7, %c0_8] : memref<2x8x32xf32, #tpu.memory_space<vmem>>, vector<2x8x32xf32>
    %27 = vector.extract_strided_slice %26 {offsets = [0, 0, 0], sizes = [1, 8, 32], strides = [1, 1, 1]} : vector<2x8x32xf32> to vector<1x8x32xf32>
    %28 = vector.shape_cast %27 : vector<1x8x32xf32> to vector<8x32xf32>
    %29 = vector.extract_strided_slice %26 {offsets = [1, 0, 0], sizes = [1, 8, 32], strides = [1, 1, 1]} : vector<2x8x32xf32> to vector<1x8x32xf32>
    %30 = vector.shape_cast %29 : vector<1x8x32xf32> to vector<8x32xf32>
    %31 = tpu.concatenate %28, %30 in 0 : vector<8x32xf32>, vector<8x32xf32> -> vector<16x32xf32>
    %c0_9 = arith.constant 0 : index
    %c0_10 = arith.constant 0 : index
    %c0_11 = arith.constant 0 : index
    %32 = vector.load %arg3[%c0_9, %c0_10, %c0_11] : memref<2x8x32xf32, #tpu.memory_space<vmem>>, vector<2x8x32xf32>
    %33 = vector.extract_strided_slice %32 {offsets = [0, 0, 0], sizes = [1, 8, 32], strides = [1, 1, 1]} : vector<2x8x32xf32> to vector<1x8x32xf32>
    %34 = vector.shape_cast %33 : vector<1x8x32xf32> to vector<8x32xf32>
    %35 = vector.extract_strided_slice %32 {offsets = [1, 0, 0], sizes = [1, 8, 32], strides = [1, 1, 1]} : vector<2x8x32xf32> to vector<1x8x32xf32>
    %36 = vector.shape_cast %35 : vector<1x8x32xf32> to vector<8x32xf32>
    %37 = tpu.concatenate %34, %36 in 0 : vector<8x32xf32>, vector<8x32xf32> -> vector<16x32xf32>
    %c0_12 = arith.constant 0 : index
    %c0_13 = arith.constant 0 : index
    %c0_14 = arith.constant 0 : index
    %38 = vector.load %arg4[%c0_12, %c0_13, %c0_14] : memref<2x8x8xf32, #tpu.memory_space<vmem>>, vector<2x8x8xf32>
    %c0_15 = arith.constant 0 : index
    %c0_16 = arith.constant 0 : index
    %c0_17 = arith.constant 0 : index
    %39 = vector.load %arg5[%c0_15, %c0_16, %c0_17] : memref<2x8x8xf32, #tpu.memory_space<vmem>>, vector<2x8x8xf32>
    %cst = arith.constant dense<0.000000e+00> : vector<16x96xf32>
    %40 = tpu.matmul %25, %2, %cst {dimension_numbers = #tpu.dot_dimension_numbers<[1], [0], [0], [1], [0, 0, 1, 1], [], []>} : vector<16x32xf32>, vector<32x96xf32>, vector<16x96xf32> -> vector<16x96xf32>
    %41 = vector.extract_strided_slice %40 {offsets = [0, 0], sizes = [16, 32], strides = [1, 1]} : vector<16x96xf32> to vector<16x32xf32>
    %42 = vector.extract_strided_slice %40 {offsets = [0, 32], sizes = [16, 32], strides = [1, 1]} : vector<16x96xf32> to vector<16x32xf32>
    %43 = vector.extract_strided_slice %40 {offsets = [0, 64], sizes = [16, 32], strides = [1, 1]} : vector<16x96xf32> to vector<16x32xf32>
    %44 = vector.extract_strided_slice %41 {offsets = [0, 0], sizes = [8, 16], strides = [1, 1]} : vector<16x32xf32> to vector<8x16xf32>
    %45 = vector.extract_strided_slice %41 {offsets = [0, 16], sizes = [8, 16], strides = [1, 1]} : vector<16x32xf32> to vector<8x16xf32>
    %46 = vector.extract_strided_slice %41 {offsets = [8, 0], sizes = [8, 16], strides = [1, 1]} : vector<16x32xf32> to vector<8x16xf32>
    %47 = vector.extract_strided_slice %41 {offsets = [8, 16], sizes = [8, 16], strides = [1, 1]} : vector<16x32xf32> to vector<8x16xf32>
    %48 = vector.shape_cast %44 : vector<8x16xf32> to vector<1x8x16xf32>
    %49 = vector.shape_cast %45 : vector<8x16xf32> to vector<1x8x16xf32>
    %50 = vector.shape_cast %46 : vector<8x16xf32> to vector<1x8x16xf32>
    %51 = vector.shape_cast %47 : vector<8x16xf32> to vector<1x8x16xf32>
    %52 = tpu.concatenate %48, %49, %50, %51 in 0 : vector<1x8x16xf32>, vector<1x8x16xf32>, vector<1x8x16xf32>, vector<1x8x16xf32> -> vector<4x8x16xf32>
    %53 = vector.extract_strided_slice %42 {offsets = [0, 0], sizes = [8, 16], strides = [1, 1]} : vector<16x32xf32> to vector<8x16xf32>
    %54 = vector.extract_strided_slice %42 {offsets = [0, 16], sizes = [8, 16], strides = [1, 1]} : vector<16x32xf32> to vector<8x16xf32>
    %55 = vector.extract_strided_slice %42 {offsets = [8, 0], sizes = [8, 16], strides = [1, 1]} : vector<16x32xf32> to vector<8x16xf32>
    %56 = vector.extract_strided_slice %42 {offsets = [8, 16], sizes = [8, 16], strides = [1, 1]} : vector<16x32xf32> to vector<8x16xf32>
    %57 = vector.shape_cast %53 : vector<8x16xf32> to vector<1x8x16xf32>
    %58 = vector.shape_cast %54 : vector<8x16xf32> to vector<1x8x16xf32>
    %59 = vector.shape_cast %55 : vector<8x16xf32> to vector<1x8x16xf32>
    %60 = vector.shape_cast %56 : vector<8x16xf32> to vector<1x8x16xf32>
    %61 = tpu.concatenate %57, %58, %59, %60 in 0 : vector<1x8x16xf32>, vector<1x8x16xf32>, vector<1x8x16xf32>, vector<1x8x16xf32> -> vector<4x8x16xf32>
    %62 = vector.extract_strided_slice %43 {offsets = [0, 0], sizes = [8, 16], strides = [1, 1]} : vector<16x32xf32> to vector<8x16xf32>
    %63 = vector.extract_strided_slice %43 {offsets = [0, 16], sizes = [8, 16], strides = [1, 1]} : vector<16x32xf32> to vector<8x16xf32>
    %64 = vector.extract_strided_slice %43 {offsets = [8, 0], sizes = [8, 16], strides = [1, 1]} : vector<16x32xf32> to vector<8x16xf32>
    %65 = vector.extract_strided_slice %43 {offsets = [8, 16], sizes = [8, 16], strides = [1, 1]} : vector<16x32xf32> to vector<8x16xf32>
    %66 = vector.shape_cast %62 : vector<8x16xf32> to vector<1x8x16xf32>
    %67 = vector.shape_cast %63 : vector<8x16xf32> to vector<1x8x16xf32>
    %68 = vector.shape_cast %64 : vector<8x16xf32> to vector<1x8x16xf32>
    %69 = vector.shape_cast %65 : vector<8x16xf32> to vector<1x8x16xf32>
    %70 = tpu.concatenate %66, %67, %68, %69 in 0 : vector<1x8x16xf32>, vector<1x8x16xf32>, vector<1x8x16xf32>, vector<1x8x16xf32> -> vector<4x8x16xf32>
    %71 = vector.extract_strided_slice %38 {offsets = [0, 0, 0], sizes = [1, 8, 8], strides = [1, 1, 1]} : vector<2x8x8xf32> to vector<1x8x8xf32>
    %72 = vector.shape_cast %71 : vector<1x8x8xf32> to vector<8x8xf32>
    %73 = vector.extract_strided_slice %38 {offsets = [0, 0, 0], sizes = [1, 8, 8], strides = [1, 1, 1]} : vector<2x8x8xf32> to vector<1x8x8xf32>
    %74 = vector.shape_cast %73 : vector<1x8x8xf32> to vector<8x8xf32>
    %75 = vector.extract_strided_slice %38 {offsets = [1, 0, 0], sizes = [1, 8, 8], strides = [1, 1, 1]} : vector<2x8x8xf32> to vector<1x8x8xf32>
    %76 = vector.shape_cast %75 : vector<1x8x8xf32> to vector<8x8xf32>
    %77 = vector.extract_strided_slice %38 {offsets = [1, 0, 0], sizes = [1, 8, 8], strides = [1, 1, 1]} : vector<2x8x8xf32> to vector<1x8x8xf32>
    %78 = vector.shape_cast %77 : vector<1x8x8xf32> to vector<8x8xf32>
    %79 = vector.shape_cast %72 : vector<8x8xf32> to vector<1x8x8xf32>
    %80 = vector.shape_cast %74 : vector<8x8xf32> to vector<1x8x8xf32>
    %81 = vector.shape_cast %76 : vector<8x8xf32> to vector<1x8x8xf32>
    %82 = vector.shape_cast %78 : vector<8x8xf32> to vector<1x8x8xf32>
    %83 = tpu.concatenate %79, %80, %81, %82 in 0 : vector<1x8x8xf32>, vector<1x8x8xf32>, vector<1x8x8xf32>, vector<1x8x8xf32> -> vector<4x8x8xf32>
    "tpu.trace_start"() <{level = 10 : i32, message = "bqd,bkd->bqk"}> : () -> ()
    %cst_18 = arith.constant dense<0.000000e+00> : vector<4x8x8xf32>
    %84 = tpu.matmul %52, %61, %cst_18 {dimension_numbers = #tpu.dot_dimension_numbers<[2], [2], [1], [1], [0, 0, 0, 1, 1, 1], [0], [0]>} : vector<4x8x16xf32>, vector<4x8x16xf32>, vector<4x8x8xf32> -> vector<4x8x8xf32>
    "tpu.trace_stop"() : () -> ()
    %cst_19 = arith.constant 2.500000e-01 : f32
    %85 = vector.broadcast %cst_19 : f32 to vector<4x8x8xf32>
    %86 = arith.mulf %84, %85 : vector<4x8x8xf32>
    %cst_20 = arith.constant 0.000000e+00 : f32
    %87 = vector.broadcast %cst_20 : f32 to vector<4x8x8xf32>
    %88 = arith.cmpf oeq, %83, %87 : vector<4x8x8xf32>
    %cst_21 = arith.constant -1.000000e+20 : f32
    %89 = vector.broadcast %cst_21 : f32 to vector<4x8x8xf32>
    %90 = arith.select %88, %89, %86 : vector<4x8x8xi1>, vector<4x8x8xf32>
    %cst_22 = arith.constant dense<0xFF800000> : vector<4x8xf32>
    %91 = vector.multi_reduction <maximumf>, %90, %cst_22 [2] : vector<4x8x8xf32> to vector<4x8xf32>
    %92 = vector.shape_cast %91 : vector<4x8xf32> to vector<4x8x1xf32>
    %93 = vector.broadcast %92 : vector<4x8x1xf32> to vector<4x8x8xf32>
    %94 = arith.subf %90, %93 : vector<4x8x8xf32>
    %95 = math.exp %94 : vector<4x8x8xf32>
    %cst_23 = arith.constant dense<0.000000e+00> : vector<4x8xf32>
    %96 = vector.multi_reduction <add>, %95, %cst_23 [2] : vector<4x8x8xf32> to vector<4x8xf32>
    %97 = vector.shape_cast %96 : vector<4x8xf32> to vector<4x8x1xf32>
    %98 = tpu.reciprocal %97 {approx = true} : vector<4x8x1xf32> -> vector<4x8x1xf32>
    %99 = vector.broadcast %98 : vector<4x8x1xf32> to vector<4x8x8xf32>
    %100 = arith.mulf %95, %99 : vector<4x8x8xf32>
    "tpu.trace_start"() <{level = 10 : i32, message = "bqk,bkd->bqd"}> : () -> ()
    %cst_24 = arith.constant dense<0.000000e+00> : vector<4x8x16xf32>
    %101 = tpu.matmul %100, %70, %cst_24 {dimension_numbers = #tpu.dot_dimension_numbers<[2], [1], [1], [2], [0, 0, 0, 1, 1, 2], [0], [0]>} : vector<4x8x8xf32>, vector<4x8x16xf32>, vector<4x8x16xf32> -> vector<4x8x16xf32>
    "tpu.trace_stop"() : () -> ()
    %102 = vector.extract_strided_slice %101 {offsets = [0, 0, 0], sizes = [1, 8, 16], strides = [1, 1, 1]} : vector<4x8x16xf32> to vector<1x8x16xf32>
    %103 = vector.shape_cast %102 : vector<1x8x16xf32> to vector<8x16xf32>
    %104 = vector.extract_strided_slice %101 {offsets = [1, 0, 0], sizes = [1, 8, 16], strides = [1, 1, 1]} : vector<4x8x16xf32> to vector<1x8x16xf32>
    %105 = vector.shape_cast %104 : vector<1x8x16xf32> to vector<8x16xf32>
    %106 = tpu.concatenate %103, %105 in 1 : vector<8x16xf32>, vector<8x16xf32> -> vector<8x32xf32>
    %107 = vector.extract_strided_slice %101 {offsets = [2, 0, 0], sizes = [1, 8, 16], strides = [1, 1, 1]} : vector<4x8x16xf32> to vector<1x8x16xf32>
    %108 = vector.shape_cast %107 : vector<1x8x16xf32> to vector<8x16xf32>
    %109 = vector.extract_strided_slice %101 {offsets = [3, 0, 0], sizes = [1, 8, 16], strides = [1, 1, 1]} : vector<4x8x16xf32> to vector<1x8x16xf32>
    %110 = vector.shape_cast %109 : vector<1x8x16xf32> to vector<8x16xf32>
    %111 = tpu.concatenate %108, %110 in 1 : vector<8x16xf32>, vector<8x16xf32> -> vector<8x32xf32>
    %112 = tpu.concatenate %106, %111 in 0 : vector<8x32xf32>, vector<8x32xf32> -> vector<16x32xf32>
    %cst_25 = arith.constant dense<0.000000e+00> : vector<16x32xf32>
    %113 = tpu.matmul %112, %3, %cst_25 {dimension_numbers = #tpu.dot_dimension_numbers<[1], [0], [0], [1], [0, 0, 1, 1], [], []>} : vector<16x32xf32>, vector<32x32xf32>, vector<16x32xf32> -> vector<16x32xf32>
    %114 = vector.broadcast %9 : vector<1x32xf32> to vector<16x32xf32>
    %115 = arith.addf %113, %114 : vector<16x32xf32>
    %116 = arith.addf %115, %25 : vector<16x32xf32>
    %cst_26 = arith.constant dense<0.000000e+00> : vector<16xf32>
    %117 = vector.multi_reduction <add>, %116, %cst_26 [1] : vector<16x32xf32> to vector<16xf32>
    %118 = vector.shape_cast %117 : vector<16xf32> to vector<16x1xf32>
    %cst_27 = arith.constant 3.200000e+01 : f32
    %119 = vector.broadcast %cst_27 : f32 to vector<16x1xf32>
    %120 = arith.divf %118, %119 : vector<16x1xf32>
    %121 = vector.broadcast %120 : vector<16x1xf32> to vector<16x32xf32>
    %122 = arith.subf %116, %121 : vector<16x32xf32>
    %123 = arith.mulf %122, %122 : vector<16x32xf32>
    %cst_28 = arith.constant dense<0.000000e+00> : vector<16xf32>
    %124 = vector.multi_reduction <add>, %123, %cst_28 [1] : vector<16x32xf32> to vector<16xf32>
    %125 = vector.shape_cast %124 : vector<16xf32> to vector<16x1xf32>
    %cst_29 = arith.constant 3.200000e+01 : f32
    %126 = vector.broadcast %cst_29 : f32 to vector<16x1xf32>
    %127 = arith.divf %125, %126 : vector<16x1xf32>
    %128 = vector.broadcast %120 : vector<16x1xf32> to vector<16x32xf32>
    %129 = arith.subf %116, %128 : vector<16x32xf32>
    %cst_30 = arith.constant 9.99999974E-6 : f32
    %130 = vector.broadcast %cst_30 : f32 to vector<16x1xf32>
    %131 = arith.addf %127, %130 : vector<16x1xf32>
    %132 = math.rsqrt %131 : vector<16x1xf32>
    %133 = vector.broadcast %132 : vector<16x1xf32> to vector<16x32xf32>
    %134 = arith.mulf %129, %133 : vector<16x32xf32>
    %135 = vector.broadcast %10 : vector<1x32xf32> to vector<16x32xf32>
    %136 = arith.mulf %134, %135 : vector<16x32xf32>
    %137 = vector.broadcast %11 : vector<1x32xf32> to vector<16x32xf32>
    %138 = arith.addf %136, %137 : vector<16x32xf32>
    %cst_31 = arith.constant dense<0.000000e+00> : vector<16x32xf32>
    %139 = tpu.matmul %138, %4, %cst_31 {dimension_numbers = #tpu.dot_dimension_numbers<[1], [0], [0], [1], [0, 0, 1, 1], [], []>} : vector<16x32xf32>, vector<32x32xf32>, vector<16x32xf32> -> vector<16x32xf32>
    %cst_32 = arith.constant dense<0.000000e+00> : vector<16x32xf32>
    %140 = tpu.matmul %37, %5, %cst_32 {dimension_numbers = #tpu.dot_dimension_numbers<[1], [0], [0], [1], [0, 0, 1, 1], [], []>} : vector<16x32xf32>, vector<32x32xf32>, vector<16x32xf32> -> vector<16x32xf32>
    %cst_33 = arith.constant dense<0.000000e+00> : vector<16x32xf32>
    %141 = tpu.matmul %31, %6, %cst_33 {dimension_numbers = #tpu.dot_dimension_numbers<[1], [0], [0], [1], [0, 0, 1, 1], [], []>} : vector<16x32xf32>, vector<32x32xf32>, vector<16x32xf32> -> vector<16x32xf32>
    %142 = vector.extract_strided_slice %139 {offsets = [0, 0], sizes = [8, 16], strides = [1, 1]} : vector<16x32xf32> to vector<8x16xf32>
    %143 = vector.extract_strided_slice %139 {offsets = [0, 16], sizes = [8, 16], strides = [1, 1]} : vector<16x32xf32> to vector<8x16xf32>
    %144 = vector.extract_strided_slice %139 {offsets = [8, 0], sizes = [8, 16], strides = [1, 1]} : vector<16x32xf32> to vector<8x16xf32>
    %145 = vector.extract_strided_slice %139 {offsets = [8, 16], sizes = [8, 16], strides = [1, 1]} : vector<16x32xf32> to vector<8x16xf32>
    %146 = vector.shape_cast %142 : vector<8x16xf32> to vector<1x8x16xf32>
    %147 = vector.shape_cast %143 : vector<8x16xf32> to vector<1x8x16xf32>
    %148 = vector.shape_cast %144 : vector<8x16xf32> to vector<1x8x16xf32>
    %149 = vector.shape_cast %145 : vector<8x16xf32> to vector<1x8x16xf32>
    %150 = tpu.concatenate %146, %147, %148, %149 in 0 : vector<1x8x16xf32>, vector<1x8x16xf32>, vector<1x8x16xf32>, vector<1x8x16xf32> -> vector<4x8x16xf32>
    %151 = vector.extract_strided_slice %140 {offsets = [0, 0], sizes = [8, 16], strides = [1, 1]} : vector<16x32xf32> to vector<8x16xf32>
    %152 = vector.extract_strided_slice %140 {offsets = [0, 16], sizes = [8, 16], strides = [1, 1]} : vector<16x32xf32> to vector<8x16xf32>
    %153 = vector.extract_strided_slice %140 {offsets = [8, 0], sizes = [8, 16], strides = [1, 1]} : vector<16x32xf32> to vector<8x16xf32>
    %154 = vector.extract_strided_slice %140 {offsets = [8, 16], sizes = [8, 16], strides = [1, 1]} : vector<16x32xf32> to vector<8x16xf32>
    %155 = vector.shape_cast %151 : vector<8x16xf32> to vector<1x8x16xf32>
    %156 = vector.shape_cast %152 : vector<8x16xf32> to vector<1x8x16xf32>
    %157 = vector.shape_cast %153 : vector<8x16xf32> to vector<1x8x16xf32>
    %158 = vector.shape_cast %154 : vector<8x16xf32> to vector<1x8x16xf32>
    %159 = tpu.concatenate %155, %156, %157, %158 in 0 : vector<1x8x16xf32>, vector<1x8x16xf32>, vector<1x8x16xf32>, vector<1x8x16xf32> -> vector<4x8x16xf32>
    %160 = vector.extract_strided_slice %141 {offsets = [0, 0], sizes = [8, 16], strides = [1, 1]} : vector<16x32xf32> to vector<8x16xf32>
    %161 = vector.extract_strided_slice %141 {offsets = [0, 16], sizes = [8, 16], strides = [1, 1]} : vector<16x32xf32> to vector<8x16xf32>
    %162 = vector.extract_strided_slice %141 {offsets = [8, 0], sizes = [8, 16], strides = [1, 1]} : vector<16x32xf32> to vector<8x16xf32>
    %163 = vector.extract_strided_slice %141 {offsets = [8, 16], sizes = [8, 16], strides = [1, 1]} : vector<16x32xf32> to vector<8x16xf32>
    %164 = vector.shape_cast %160 : vector<8x16xf32> to vector<1x8x16xf32>
    %165 = vector.shape_cast %161 : vector<8x16xf32> to vector<1x8x16xf32>
    %166 = vector.shape_cast %162 : vector<8x16xf32> to vector<1x8x16xf32>
    %167 = vector.shape_cast %163 : vector<8x16xf32> to vector<1x8x16xf32>
    %168 = tpu.concatenate %164, %165, %166, %167 in 0 : vector<1x8x16xf32>, vector<1x8x16xf32>, vector<1x8x16xf32>, vector<1x8x16xf32> -> vector<4x8x16xf32>
    %169 = vector.extract_strided_slice %39 {offsets = [0, 0, 0], sizes = [1, 8, 8], strides = [1, 1, 1]} : vector<2x8x8xf32> to vector<1x8x8xf32>
    %170 = vector.shape_cast %169 : vector<1x8x8xf32> to vector<8x8xf32>
    %171 = vector.extract_strided_slice %39 {offsets = [0, 0, 0], sizes = [1, 8, 8], strides = [1, 1, 1]} : vector<2x8x8xf32> to vector<1x8x8xf32>
    %172 = vector.shape_cast %171 : vector<1x8x8xf32> to vector<8x8xf32>
    %173 = vector.extract_strided_slice %39 {offsets = [1, 0, 0], sizes = [1, 8, 8], strides = [1, 1, 1]} : vector<2x8x8xf32> to vector<1x8x8xf32>
    %174 = vector.shape_cast %173 : vector<1x8x8xf32> to vector<8x8xf32>
    %175 = vector.extract_strided_slice %39 {offsets = [1, 0, 0], sizes = [1, 8, 8], strides = [1, 1, 1]} : vector<2x8x8xf32> to vector<1x8x8xf32>
    %176 = vector.shape_cast %175 : vector<1x8x8xf32> to vector<8x8xf32>
    %177 = vector.shape_cast %170 : vector<8x8xf32> to vector<1x8x8xf32>
    %178 = vector.shape_cast %172 : vector<8x8xf32> to vector<1x8x8xf32>
    %179 = vector.shape_cast %174 : vector<8x8xf32> to vector<1x8x8xf32>
    %180 = vector.shape_cast %176 : vector<8x8xf32> to vector<1x8x8xf32>
    %181 = tpu.concatenate %177, %178, %179, %180 in 0 : vector<1x8x8xf32>, vector<1x8x8xf32>, vector<1x8x8xf32>, vector<1x8x8xf32> -> vector<4x8x8xf32>
    "tpu.trace_start"() <{level = 10 : i32, message = "bqd,bkd->bqk"}> : () -> ()
    %cst_34 = arith.constant dense<0.000000e+00> : vector<4x8x8xf32>
    %182 = tpu.matmul %150, %159, %cst_34 {dimension_numbers = #tpu.dot_dimension_numbers<[2], [2], [1], [1], [0, 0, 0, 1, 1, 1], [0], [0]>} : vector<4x8x16xf32>, vector<4x8x16xf32>, vector<4x8x8xf32> -> vector<4x8x8xf32>
    "tpu.trace_stop"() : () -> ()
    %cst_35 = arith.constant 2.500000e-01 : f32
    %183 = vector.broadcast %cst_35 : f32 to vector<4x8x8xf32>
    %184 = arith.mulf %182, %183 : vector<4x8x8xf32>
    %cst_36 = arith.constant 0.000000e+00 : f32
    %185 = vector.broadcast %cst_36 : f32 to vector<4x8x8xf32>
    %186 = arith.cmpf oeq, %181, %185 : vector<4x8x8xf32>
    %cst_37 = arith.constant -1.000000e+20 : f32
    %187 = vector.broadcast %cst_37 : f32 to vector<4x8x8xf32>
    %188 = arith.select %186, %187, %184 : vector<4x8x8xi1>, vector<4x8x8xf32>
    %cst_38 = arith.constant dense<0xFF800000> : vector<4x8xf32>
    %189 = vector.multi_reduction <maximumf>, %188, %cst_38 [2] : vector<4x8x8xf32> to vector<4x8xf32>
    %190 = vector.shape_cast %189 : vector<4x8xf32> to vector<4x8x1xf32>
    %191 = vector.broadcast %190 : vector<4x8x1xf32> to vector<4x8x8xf32>
    %192 = arith.subf %188, %191 : vector<4x8x8xf32>
    %193 = math.exp %192 : vector<4x8x8xf32>
    %cst_39 = arith.constant dense<0.000000e+00> : vector<4x8xf32>
    %194 = vector.multi_reduction <add>, %193, %cst_39 [2] : vector<4x8x8xf32> to vector<4x8xf32>
    %195 = vector.shape_cast %194 : vector<4x8xf32> to vector<4x8x1xf32>
    %196 = tpu.reciprocal %195 {approx = true} : vector<4x8x1xf32> -> vector<4x8x1xf32>
    %197 = vector.broadcast %196 : vector<4x8x1xf32> to vector<4x8x8xf32>
    %198 = arith.mulf %193, %197 : vector<4x8x8xf32>
    "tpu.trace_start"() <{level = 10 : i32, message = "bqk,bkd->bqd"}> : () -> ()
    %cst_40 = arith.constant dense<0.000000e+00> : vector<4x8x16xf32>
    %199 = tpu.matmul %198, %168, %cst_40 {dimension_numbers = #tpu.dot_dimension_numbers<[2], [1], [1], [2], [0, 0, 0, 1, 1, 2], [0], [0]>} : vector<4x8x8xf32>, vector<4x8x16xf32>, vector<4x8x16xf32> -> vector<4x8x16xf32>
    "tpu.trace_stop"() : () -> ()
    %200 = vector.extract_strided_slice %199 {offsets = [0, 0, 0], sizes = [1, 8, 16], strides = [1, 1, 1]} : vector<4x8x16xf32> to vector<1x8x16xf32>
    %201 = vector.shape_cast %200 : vector<1x8x16xf32> to vector<8x16xf32>
    %202 = vector.extract_strided_slice %199 {offsets = [1, 0, 0], sizes = [1, 8, 16], strides = [1, 1, 1]} : vector<4x8x16xf32> to vector<1x8x16xf32>
    %203 = vector.shape_cast %202 : vector<1x8x16xf32> to vector<8x16xf32>
    %204 = tpu.concatenate %201, %203 in 1 : vector<8x16xf32>, vector<8x16xf32> -> vector<8x32xf32>
    %205 = vector.extract_strided_slice %199 {offsets = [2, 0, 0], sizes = [1, 8, 16], strides = [1, 1, 1]} : vector<4x8x16xf32> to vector<1x8x16xf32>
    %206 = vector.shape_cast %205 : vector<1x8x16xf32> to vector<8x16xf32>
    %207 = vector.extract_strided_slice %199 {offsets = [3, 0, 0], sizes = [1, 8, 16], strides = [1, 1, 1]} : vector<4x8x16xf32> to vector<1x8x16xf32>
    %208 = vector.shape_cast %207 : vector<1x8x16xf32> to vector<8x16xf32>
    %209 = tpu.concatenate %206, %208 in 1 : vector<8x16xf32>, vector<8x16xf32> -> vector<8x32xf32>
    %210 = tpu.concatenate %204, %209 in 0 : vector<8x32xf32>, vector<8x32xf32> -> vector<16x32xf32>
    %cst_41 = arith.constant dense<0.000000e+00> : vector<16x32xf32>
    %211 = tpu.matmul %210, %7, %cst_41 {dimension_numbers = #tpu.dot_dimension_numbers<[1], [0], [0], [1], [0, 0, 1, 1], [], []>} : vector<16x32xf32>, vector<32x32xf32>, vector<16x32xf32> -> vector<16x32xf32>
    %212 = vector.broadcast %12 : vector<1x32xf32> to vector<16x32xf32>
    %213 = arith.addf %211, %212 : vector<16x32xf32>
    %214 = arith.addf %213, %138 : vector<16x32xf32>
    %cst_42 = arith.constant dense<0.000000e+00> : vector<16xf32>
    %215 = vector.multi_reduction <add>, %214, %cst_42 [1] : vector<16x32xf32> to vector<16xf32>
    %216 = vector.shape_cast %215 : vector<16xf32> to vector<16x1xf32>
    %cst_43 = arith.constant 3.200000e+01 : f32
    %217 = vector.broadcast %cst_43 : f32 to vector<16x1xf32>
    %218 = arith.divf %216, %217 : vector<16x1xf32>
    %219 = vector.broadcast %218 : vector<16x1xf32> to vector<16x32xf32>
    %220 = arith.subf %214, %219 : vector<16x32xf32>
    %221 = arith.mulf %220, %220 : vector<16x32xf32>
    %cst_44 = arith.constant dense<0.000000e+00> : vector<16xf32>
    %222 = vector.multi_reduction <add>, %221, %cst_44 [1] : vector<16x32xf32> to vector<16xf32>
    %223 = vector.shape_cast %222 : vector<16xf32> to vector<16x1xf32>
    %cst_45 = arith.constant 3.200000e+01 : f32
    %224 = vector.broadcast %cst_45 : f32 to vector<16x1xf32>
    %225 = arith.divf %223, %224 : vector<16x1xf32>
    %226 = vector.broadcast %218 : vector<16x1xf32> to vector<16x32xf32>
    %227 = arith.subf %214, %226 : vector<16x32xf32>
    %cst_46 = arith.constant 9.99999974E-6 : f32
    %228 = vector.broadcast %cst_46 : f32 to vector<16x1xf32>
    %229 = arith.addf %225, %228 : vector<16x1xf32>
    %230 = math.rsqrt %229 : vector<16x1xf32>
    %231 = vector.broadcast %230 : vector<16x1xf32> to vector<16x32xf32>
    %232 = arith.mulf %227, %231 : vector<16x32xf32>
    %233 = vector.broadcast %13 : vector<1x32xf32> to vector<16x32xf32>
    %234 = arith.mulf %232, %233 : vector<16x32xf32>
    %235 = vector.broadcast %14 : vector<1x32xf32> to vector<16x32xf32>
    %236 = arith.addf %234, %235 : vector<16x32xf32>
    %cst_47 = arith.constant dense<0.000000e+00> : vector<16x128xf32>
    %237 = tpu.matmul %236, %8, %cst_47 {dimension_numbers = #tpu.dot_dimension_numbers<[1], [0], [0], [1], [0, 0, 1, 1], [], []>} : vector<16x32xf32>, vector<32x128xf32>, vector<16x128xf32> -> vector<16x128xf32>
    %238 = vector.broadcast %18 : vector<1x128xf32> to vector<16x128xf32>
    %239 = arith.addf %237, %238 : vector<16x128xf32>
    %cst_48 = arith.constant 0.000000e+00 : f32
    %240 = vector.broadcast %cst_48 : f32 to vector<16x128xf32>
    %241 = arith.maximumf %239, %240 : vector<16x128xf32>
    %cst_49 = arith.constant dense<0.000000e+00> : vector<16x32xf32>
    %242 = tpu.matmul %241, %19, %cst_49 {dimension_numbers = #tpu.dot_dimension_numbers<[1], [0], [0], [1], [0, 0, 1, 1], [], []>} : vector<16x128xf32>, vector<128x32xf32>, vector<16x32xf32> -> vector<16x32xf32>
    %243 = vector.broadcast %15 : vector<1x32xf32> to vector<16x32xf32>
    %244 = arith.addf %242, %243 : vector<16x32xf32>
    %245 = arith.addf %244, %236 : vector<16x32xf32>
    %cst_50 = arith.constant dense<0.000000e+00> : vector<16xf32>
    %246 = vector.multi_reduction <add>, %245, %cst_50 [1] : vector<16x32xf32> to vector<16xf32>
    %247 = vector.shape_cast %246 : vector<16xf32> to vector<16x1xf32>
    %cst_51 = arith.constant 3.200000e+01 : f32
    %248 = vector.broadcast %cst_51 : f32 to vector<16x1xf32>
    %249 = arith.divf %247, %248 : vector<16x1xf32>
    %250 = vector.broadcast %249 : vector<16x1xf32> to vector<16x32xf32>
    %251 = arith.subf %245, %250 : vector<16x32xf32>
    %252 = arith.mulf %251, %251 : vector<16x32xf32>
    %cst_52 = arith.constant dense<0.000000e+00> : vector<16xf32>
    %253 = vector.multi_reduction <add>, %252, %cst_52 [1] : vector<16x32xf32> to vector<16xf32>
    %254 = vector.shape_cast %253 : vector<16xf32> to vector<16x1xf32>
    %cst_53 = arith.constant 3.200000e+01 : f32
    %255 = vector.broadcast %cst_53 : f32 to vector<16x1xf32>
    %256 = arith.divf %254, %255 : vector<16x1xf32>
    %257 = vector.broadcast %249 : vector<16x1xf32> to vector<16x32xf32>
    %258 = arith.subf %245, %257 : vector<16x32xf32>
    %cst_54 = arith.constant 9.99999974E-6 : f32
    %259 = vector.broadcast %cst_54 : f32 to vector<16x1xf32>
    %260 = arith.addf %256, %259 : vector<16x1xf32>
    %261 = math.rsqrt %260 : vector<16x1xf32>
    %262 = vector.broadcast %261 : vector<16x1xf32> to vector<16x32xf32>
    %263 = arith.mulf %258, %262 : vector<16x32xf32>
    %264 = vector.broadcast %16 : vector<1x32xf32> to vector<16x32xf32>
    %265 = arith.mulf %263, %264 : vector<16x32xf32>
    %266 = vector.broadcast %17 : vector<1x32xf32> to vector<16x32xf32>
    %267 = arith.addf %265, %266 : vector<16x32xf32>
    %268 = vector.extract_strided_slice %267 {offsets = [0, 0], sizes = [8, 32], strides = [1, 1]} : vector<16x32xf32> to vector<8x32xf32>
    %c0_55 = arith.constant 0 : index
    %c0_56 = arith.constant 0 : index
    %c0_57 = arith.constant 0 : index
    %269 = vector.load %arg8[%c0_55, %c0_56, %c0_57] : memref<2x8x32xf32, #tpu.memory_space<vmem>>, vector<1x8x32xf32>
    %270 = vector.shape_cast %269 : vector<1x8x32xf32> to vector<8x32xf32>
    %271 = vector.shape_cast %268 : vector<8x32xf32> to vector<1x8x32xf32>
    tpu.vector_store %arg8[%c0_55, %c0_56, %c0_57], %271 {strides = array<i32>} : memref<2x8x32xf32, #tpu.memory_space<vmem>>, vector<1x8x32xf32>,
    %272 = vector.extract_strided_slice %267 {offsets = [8, 0], sizes = [8, 32], strides = [1, 1]} : vector<16x32xf32> to vector<8x32xf32>
    %c1 = arith.constant 1 : index
    %c0_58 = arith.constant 0 : index
    %c0_59 = arith.constant 0 : index
    %273 = vector.load %arg8[%c1, %c0_58, %c0_59] : memref<2x8x32xf32, #tpu.memory_space<vmem>>, vector<1x8x32xf32>
    %274 = vector.shape_cast %273 : vector<1x8x32xf32> to vector<8x32xf32>
    %275 = vector.shape_cast %272 : vector<8x32xf32> to vector<1x8x32xf32>
    tpu.vector_store %arg8[%c1, %c0_58, %c0_59], %275 {strides = array<i32>} : memref<2x8x32xf32, #tpu.memory_space<vmem>>, vector<1x8x32xf32>,
    %276 = vector.shape_cast %198 : vector<4x8x8xf32> to vector<2x2x8x8xf32>
    %c0_60 = arith.constant 0 : index
    %c0_61 = arith.constant 0 : index
    %c0_62 = arith.constant 0 : index
    %c0_63 = arith.constant 0 : index
    %277 = vector.load %arg9[%c0_60, %c0_61, %c0_62, %c0_63] : memref<2x2x8x8xf32, #tpu.memory_space<vmem>>, vector<2x2x8x8xf32>
    tpu.vector_store %arg9[%c0_60, %c0_61, %c0_62, %c0_63], %276 {strides = array<i32>} : memref<2x2x8x8xf32, #tpu.memory_space<vmem>>, vector<2x2x8x8xf32>,
    return
  }
  func.func @transform_0(%arg0: i32) -> (i32, i32, i32) {
    %c0_i32 = arith.constant 0 : i32
    %c0_i32_0 = arith.constant 0 : i32
    %c0_i32_1 = arith.constant 0 : i32
    %c0_i32_2 = arith.constant 0 : i32
    return %c0_i32, %c0_i32_0, %c0_i32_1 : i32, i32, i32
  }
  func.func @transform_1(%arg0: i32) -> (i32, i32, i32) {
    %c0_i32 = arith.constant 0 : i32
    %c0_i32_0 = arith.constant 0 : i32
    %c0_i32_1 = arith.constant 0 : i32
    %c0_i32_2 = arith.constant 0 : i32
    return %c0_i32, %c0_i32_0, %c0_i32_1 : i32, i32, i32
  }
  func.func @transform_2(%arg0: i32) -> (i32, i32, i32) {
    %c0_i32 = arith.constant 0 : i32
    %c0_i32_0 = arith.constant 0 : i32
    %c0_i32_1 = arith.constant 0 : i32
    %c0_i32_2 = arith.constant 0 : i32
    return %c0_i32, %c0_i32_0, %c0_i32_1 : i32, i32, i32
  }
  func.func @transform_3(%arg0: i32) -> (i32, i32, i32) {
    %c0_i32 = arith.constant 0 : i32
    %c0_i32_0 = arith.constant 0 : i32
    %c0_i32_1 = arith.constant 0 : i32
    %c0_i32_2 = arith.constant 0 : i32
    return %c0_i32, %c0_i32_0, %c0_i32_1 : i32, i32, i32
  }
  func.func @transform_4(%arg0: i32) -> (i32, i32, i32) {
    %c0_i32 = arith.constant 0 : i32
    %c0_i32_0 = arith.constant 0 : i32
    %c0_i32_1 = arith.constant 0 : i32
    %c0_i32_2 = arith.constant 0 : i32
    return %c0_i32, %c0_i32_0, %c0_i32_1 : i32, i32, i32
  }
  func.func @transform_5(%arg0: i32) -> (i32, i32) {
    %c0_i32 = arith.constant 0 : i32
    %c0_i32_0 = arith.constant 0 : i32
    %c0_i32_1 = arith.constant 0 : i32
    return %c0_i32, %c0_i32_0 : i32, i32
  }
  func.func @transform_6(%arg0: i32) -> (i32, i32) {
    %c0_i32 = arith.constant 0 : i32
    %c0_i32_0 = arith.constant 0 : i32
    %c0_i32_1 = arith.constant 0 : i32
    return %c0_i32, %c0_i32_0 : i32, i32
  }
  func.func @transform_7(%arg0: i32) -> (i32, i32, i32) {
    %c0_i32 = arith.constant 0 : i32
    %c0_i32_0 = arith.constant 0 : i32
    %c0_i32_1 = arith.constant 0 : i32
    %c0_i32_2 = arith.constant 0 : i32
    return %c0_i32, %c0_i32_0, %c0_i32_1 : i32, i32, i32
  }
  func.func @transform_8(%arg0: i32) -> (i32, i32, i32, i32) {
    %c0_i32 = arith.constant 0 : i32
    %c0_i32_0 = arith.constant 0 : i32
    %c0_i32_1 = arith.constant 0 : i32
    %c0_i32_2 = arith.constant 0 : i32
    %c0_i32_3 = arith.constant 0 : i32
    return %c0_i32, %c0_i32_0, %c0_i32_1, %c0_i32_2 : i32, i32, i32, i32
  }
}

</mosaic_0001>

<bundles_post_ra>
// kernel: decoder_block_forward.1
= control target key start
LH: loop header
LB: loop body
LE: loop exit
PB: predicated region body
PF: predicated region fallthrough
CT: control target
= control target key end

     0   :  { %14 = vsyncpa [#allocation3], 0  ;;  %s3380_s0 = inlined_call_operand.hbm [shape: f32[2,8,32], index: 0, kind: input, shape index: {}]   ;;  %s3381_s1 = inlined_call_operand.hbm [shape: f32[2,8,32], index: 1, kind: input, shape index: {}]   ;;  %s3382_s2 = inlined_call_operand.hbm [shape: f32[2,8,32], index: 2, kind: input, shape index: {}]   ;;  %s3383_s3 = inlined_call_operand.hbm [shape: f32[2,8,8], index: 3, kind: input, shape index: {}]   ;;  %s3384_s4 = inlined_call_operand.hbm [shape: f32[2,8,8], index: 4, kind: input, shape index: {}]   ;;  %s3385_s5 = inlined_call_operand.hbm [shape: f32[32,384], index: 5, kind: input, shape index: {}]   ;;  %s3386_s6 = inlined_call_operand.hbm [shape: f32[144,128], index: 6, kind: input, shape index: {}]   ;;  %s3387_s7 = inlined_call_operand.hbm [shape: f32[2,8,32], index: 7, kind: output, shape index: {0}]   ;;  %s3388_s8 = inlined_call_operand.hbm [shape: f32[2,2,8,8], index: 8, kind: output, shape index: {1}]  }
   0x1   :  { %15 = vsyncpa [#allocation6], 0 }
   0x2   :  { %16 = vsyncpa [#allocation9], 0 }
   0x3   :  { %17 = vsyncpa [#allocation12], 0 }
   0x4   :  { %18 = vsyncpa [#allocation4], 0 }
   0x5   :  { %19 = vsyncpa [#allocation16], 0  ;;  %s2976_s27 = smov [#allocation5]   ;;  %s2977_s29 = smov [#allocation8]  }
   0x6   :  { %s37_s28 = sshll.u32 %s2976_s27, 4  ;;  %s61_s30 = sshll.u32 %s2977_s29, 4  ;;  %s38_s28 = int_to_ptr.vmem [resolvable:$true] %s37_s28  ;;  %s62_s30 = int_to_ptr.vmem [resolvable:$true] %s61_s30 }
   0x7   :  { %s2792_s9 = scalar_lea.vmem %s38_s28, 256  ;;  %p2797_p1 = scmp.lt.s32.totalorder %s38_s28, %s38_s28 }
   0x8   :  { %p2793_p0 = scmp.ne.s32.totalorder %s38_s28, %s2792_s9  ;;  %p2798_p2 = scmp.lt.s32.totalorder %s2792_s9, %s2792_s9 }
   0xa   :  { %p2799_p3 = por %p2798_p2, %p2797_p1 }
   0xc   :  { %p2800_p4 = pnand %p2799_p3, %p2793_p0 }
   0xe   :  { %2803 = shalt.err (!%p2800_p4)
}
   0xf   :  { %s2978_s10 = smov 128   ;;  %s2979_s11 = smov 8  }
  0x10   :  { %43 = dma.hbm_to_vmem [thread:$0]  %s3381_s1, 256, %s38_s28, [#allocation6], %s2978_s10, %s2978_s10, %s2979_s11  }
  0x11   :  { %s2812_s14 = scalar_lea.vmem %s62_s30, 256  ;;  %p2817_p6 = scmp.lt.s32.totalorder %s62_s30, %s62_s30 }
  0x12   :  { %p2813_p5 = scmp.ne.s32.totalorder %s62_s30, %s2812_s14  ;;  %p2818_p7 = scmp.lt.s32.totalorder %s2812_s14, %s2812_s14 }
  0x14   :  { %p2819_p8 = por %p2818_p7, %p2817_p6 }
  0x16   :  { %p2820_p9 = pnand %p2819_p8, %p2813_p5 }
  0x18   :  { %2823 = shalt.err (!%p2820_p9)
}
  0x19   :  { %67 = dma.hbm_to_vmem [thread:$0]  %s3383_s3, 256, %s62_s30, [#allocation9], %s2978_s10, %s2978_s10, %s2979_s11  }
  0x1a   :  { %s2980_s17 = smov [#allocation11]  }
  0x1b   :  { %s85_s18 = sshll.u32 %s2980_s17, 4  ;;  %s86_s18 = int_to_ptr.vmem [resolvable:$true] %s85_s18 }
  0x1c   :  { %s2832_s19 = scalar_lea.vmem %s86_s18, 1536  ;;  %p2837_p11 = scmp.lt.s32.totalorder %s86_s18, %s86_s18 }
  0x1d   :  { %p2833_p10 = scmp.ne.s32.totalorder %s86_s18, %s2832_s19  ;;  %p2838_p12 = scmp.lt.s32.totalorder %s2832_s19, %s2832_s19 }
  0x1f   :  { %p2839_p13 = por %p2838_p12, %p2837_p11 }
  0x21   :  { %p2840_p0 = pnand %p2839_p13, %p2833_p10 }
  0x23   :  { %2843 = shalt.err (!%p2840_p0)
}
  0x24   :  { %s2981_s1 = smov 384   ;;  %s2982_s20 = smov 24  }
  0x25   :  { %91 = dma.hbm_to_vmem [thread:$0]  %s3385_s5, 1536, %s86_s18, [#allocation12], %s2981_s1, %s2981_s1, %s2982_s20  }
  0x26   :  { %s2983_s23 = smov [#allocation2]   ;;  %s2984_s3 = smov [#allocation7]  }
  0x27   :  { %s25_s24 = sshll.u32 %s2983_s23, 4  ;;  %s49_s25 = sshll.u32 %s2984_s3, 4  ;;  %s26_s24 = int_to_ptr.vmem [resolvable:$true] %s25_s24  ;;  %s50_s25 = int_to_ptr.vmem [resolvable:$true] %s49_s25 }
  0x28   :  { %s2852_s26 = scalar_lea.vmem %s26_s24, 256  ;;  %p2857_p2 = scmp.lt.s32.totalorder %s26_s24, %s26_s24 }
  0x29   :  { %p2853_p1 = scmp.ne.s32.totalorder %s26_s24, %s2852_s26  ;;  %p2858_p3 = scmp.lt.s32.totalorder %s2852_s26, %s2852_s26 }
  0x2b   :  { %p2859_p4 = por %p2858_p3, %p2857_p2 }
  0x2d   :  { %p2860_p5 = pnand %p2859_p4, %p2853_p1 }
  0x2f   :  { %2863 = shalt.err (!%p2860_p5)
}
  0x30   :  { %31 = dma.hbm_to_vmem [thread:$0]  %s3380_s0, 256, %s26_s24, [#allocation3], %s2978_s10, %s2978_s10, %s2979_s11  }
  0x31   :  { %s2872_s5 = scalar_lea.vmem %s50_s25, 256  ;;  %p2877_p7 = scmp.lt.s32.totalorder %s50_s25, %s50_s25 }
  0x32   :  { %p2873_p6 = scmp.ne.s32.totalorder %s50_s25, %s2872_s5  ;;  %p2878_p8 = scmp.lt.s32.totalorder %s2872_s5, %s2872_s5 }
  0x34   :  { %p2879_p9 = por %p2878_p8, %p2877_p7 }
  0x36   :  { %p2880_p10 = pnand %p2879_p9, %p2873_p6 }
  0x38   :  { %2883 = shalt.err (!%p2880_p10)
}
  0x39   :  { %55 = dma.hbm_to_vmem [thread:$0]  %s3382_s2, 256, %s50_s25, [#allocation6], %s2978_s10, %s2978_s10, %s2979_s11  }
  0x3a   :  { %s2985_s9 = smov [#allocation10]   ;;  %s2986_s13 = smov [#allocation13]  }
  0x3b   :  { %s73_s12 = sshll.u32 %s2985_s9, 4  ;;  %s97_s0 = sshll.u32 %s2986_s13, 4  ;;  %s74_s12 = int_to_ptr.vmem [resolvable:$true] %s73_s12  ;;  %s98_s0 = int_to_ptr.vmem [resolvable:$true] %s97_s0 }
  0x3c   :  { %s2892_s14 = scalar_lea.vmem %s74_s12, 256  ;;  %p2897_p12 = scmp.lt.s32.totalorder %s74_s12, %s74_s12 }
  0x3d   :  { %p2893_p11 = scmp.ne.s32.totalorder %s74_s12, %s2892_s14  ;;  %p2898_p13 = scmp.lt.s32.totalorder %s2892_s14, %s2892_s14 }
  0x3f   :  { %p2899_p0 = por %p2898_p13, %p2897_p12 }
  0x41   :  { %p2900_p1 = pnand %p2899_p0, %p2893_p11 }
  0x43   :  { %2903 = shalt.err (!%p2900_p1)
}
  0x44   :  { %79 = dma.hbm_to_vmem [thread:$0]  %s3384_s4, 256, %s74_s12, [#allocation9], %s2978_s10, %s2978_s10, %s2979_s11  }
  0x45   :  { %s2912_s2 = scalar_lea.vmem %s98_s0, 2304  ;;  %p2917_p3 = scmp.lt.s32.totalorder %s98_s0, %s98_s0 }
  0x46   :  { %p2913_p2 = scmp.ne.s32.totalorder %s98_s0, %s2912_s2  ;;  %p2918_p4 = scmp.lt.s32.totalorder %s2912_s2, %s2912_s2 }
  0x48   :  { %p2919_p5 = por %p2918_p4, %p2917_p3 }
  0x4a   :  { %p2920_p6 = pnand %p2919_p5, %p2913_p2 }
  0x4c   :  { %2923 = shalt.err (!%p2920_p6)
}
  0x4d   :  { %103 = dma.hbm_to_vmem [thread:$0]  %s3386_s6, 2304, %s98_s0, [#allocation12], %s2978_s10, %s2978_s10, %s2979_s11  }
  0x4e   :  { %2964 = dma.done.wait [#allocation3], 256  }
  0x4f   :  { %2965 = vsyncadd [#allocation3], 4294967040 }
  0x50   :  { %2966 = dma.done.wait [#allocation6], 512  }
  0x51   :  { %2967 = vsyncadd [#allocation6], 4294966784 }
  0x52   :  { %2968 = dma.done.wait [#allocation9], 512  }
  0x53   :  { %2969 = vsyncadd [#allocation9], 4294966784 }
  0x54   :  { %2970 = dma.done.wait [#allocation12], 3840  }
  0x55   :  { %2971 = vsyncadd [#allocation12], 4294963456  ;;  %vm165_vm0 = vcmask 261120   ;;  %v3080_v0 = vld [vmem:[#allocation11 + $0x48] sm:$0xff]  ;;  %v3082_v1 = vld [vmem:[#allocation11 + $0x30] sm:$0xff]  ;;  %v2987_v6 = vmov 0.0  }
  0x56   :  { %2528 = vmatprep.subr.mxu1 %v3080_v0  ;;  %v3085_v2 = vld [vmem:[#allocation2] sm:$0xff]  ;;  %v3088_v3 = vld [vmem:[#allocation11 + $0x18] sm:$0xff]  ;;  %v3094_v4 = vld [vmem:[#allocation11] sm:$0xff]  ;;  %2549 = vmatprep.subr.mxu0 %v2987_v6  ;;  %vm2988_vm1 = vmmov 0   ;;  %s2989_s4 = smov 96   ;;  %s2990_s6 = smov 112  }
  0x57   :  { %2529 = vmatpush3.msra.mxu1 %v3080_v0  ;;  %2536 = vmatprep.mubr.msk.f32.mxu1 %vm165_vm0, %v3085_v2  ;;  %v3098_v5 = vld [vmem:[#allocation2 + $0x8] sm:$0xff]  ;;  %vm255_vm2 = vcmask 130048   ;;  %v161_v17 = vld [vmem:[#allocation8] sm:$0xff]  ;;  %v162_v21 = vld [vmem:[#allocation8 + $0x8] sm:$0xff]  ;;  %vm568_vm4 = vcmask 64512   ;;  %s2991_s19 = smov 64  }
  0x58   :  { %2530 = vmatprep.subr.mxu1 %v3082_v1  ;;  %2551 = vmatprep.mubr.msk.f32.mxu0 %vm2988_vm1, %v2987_v6  ;;  %vm562_vm3 = vcmp.eq.f32.partialorder %v161_v17, 0.0  ;;  %vm563_vm5 = vcmp.eq.f32.partialorder %v162_v21, 0.0  ;;  %s2992_s1 = smov 32   ;;  %s2993_s20 = smov 16  }
  0x59   :  { %2531 = vmatpush3.msra.mxu1 %v3082_v1  ;;  %s2994_s21 = smov [#allocation15]  }
  0x5a   :  { %2532 = vmatprep.subr.mxu1 %v3088_v3  ;;  %s2379_s22 = sshll.u32 %s2994_s21, 4  ;;  %s2380_s22 = int_to_ptr.vmem [resolvable:$true] %s2379_s22 }
  0x5b   :  { %2533 = vmatpush3.msra.mxu1 %v3088_v3  ;;  %s2924_s23 = scalar_lea.vmem %s2380_s22, 512  ;;  %p2929_p8 = scmp.lt.s32.totalorder %s2380_s22, %s2380_s22 }
  0x5c   :  { %2534 = vmatprep.subr.mxu1 %v3094_v4  ;;  %p2925_p7 = scmp.ne.s32.totalorder %s2380_s22, %s2924_s23  ;;  %p2930_p9 = scmp.lt.s32.totalorder %s2924_s23, %s2924_s23 }
  0x5d   :  { %2535 = vmatpush3.msra.mxu1 %v3094_v4 }
  0x5e   :  { %2537 = vmatmul.mubr.msk.f32.vlgmr.msra.gmra.mxu1 %vm165_vm0, %v3098_v5  ;;  %2539 = vmatprep.subr.mxu1 %v2987_v6  ;;  %p2931_p10 = por %p2930_p9, %p2929_p8 }
  0x5f   :  { %2541 = vmatprep.mubr.msk.f32.mxu1 %vm2988_vm1, %v2987_v6 }
  0x60   :  { %p2932_p11 = pnand %p2931_p10, %p2925_p7 }
 0x11e   :  { %v3110_v7 = vpop.f32.mrf.mxu1 }
 0x120   :  { %v3112_v8 = vpop.f32.mrf.mxu1 }
 0x121   :  { %253 = vrot.lane.b32.xlu1 %v3112_v8, %s2989_s4  ;;  %248 = vrot.lane.b32.xlu0 %v3112_v8, %s2990_s6 }
 0x125   :  { %251 = vrot.lane.b32.xlu0 %v3110_v7, %s2990_s6 }
 0x193   :  { %v254_v9 = vpop.permute.xlu1 %253  ;;  %v3120_v10 = vpop.permute.xlu0 %248 }
 0x194   :  { %2540 = vmatpush3.xpose.msk.msra.mxu1 %vm255_vm2, %v254_v9  ;;  %330 = vrot.lane.b32.xlu1 %v3120_v10, %s2989_s4 }
 0x195   :  { %2544 = vmatprep.subr.mxu1 %v2987_v6 }
 0x197   :  { %2542 = vmatmul.mubr.msk.f32.vlgmr.msra.gmra.mxu1 %vm255_vm2, %v3112_v8  ;;  %v3128_v11 = vpop.permute.xlu0 %251 }
 0x198   :  { %406 = vrot.lane.b32.xlu1 %v3110_v7, %s2989_s4  ;;  %482 = vrot.lane.b32.xlu0 %v3128_v11, %s2989_s4 }
 0x199   :  { %2546 = vmatprep.mubr.msk.f32.mxu1 %vm2988_vm1, %v2987_v6 }
 0x206   :  { %v331_v12 = vpop.permute.xlu1 %330 }
 0x207   :  { %2545 = vmatpush3.xpose.msk.msra.mxu1 %vm255_vm2, %v331_v12 }
 0x208   :  { %2554 = vmatprep.subr.mxu1 %v2987_v6 }
 0x20a   :  { %2547 = vmatmul.mubr.msk.f32.vlgmr.msra.gmra.mxu1 %vm255_vm2, %v3120_v10  ;;  %v407_v13 = vpop.permute.xlu1 %406  ;;  %v483_v14 = vpop.permute.xlu0 %482 }
 0x20b   :  { %2550 = vmatpush3.xpose.msk.msra.mxu0 %vm255_vm2, %v407_v13  ;;  %2555 = vmatpush3.xpose.msk.msra.mxu1 %vm255_vm2, %v483_v14 }
 0x20c   :  { %2556 = vmatprep.mubr.msk.f32.mxu1 %vm2988_vm1, %v2987_v6  ;;  %2564 = vmatprep.subr.mxu1 %v2987_v6 }
 0x20d   :  { %2559 = vmatprep.subr.mxu0 %v2987_v6 }
 0x20e   :  { %2552 = vmatmul.mubr.msk.f32.vlgmr.msra.gmra.mxu0 %vm255_vm2, %v3110_v7  ;;  %2557 = vmatmul.mubr.msk.f32.vlgmr.msra.gmra.mxu1 %vm255_vm2, %v3128_v11 }
 0x20f   :  { %2566 = vmatprep.mubr.msk.f32.mxu1 %vm2988_vm1, %v2987_v6  ;;  %2561 = vmatprep.mubr.msk.f32.mxu0 %vm2988_vm1, %v2987_v6 }
 0x257   :  { %v326_v15 = vpop.f32.mrf.mxu1 }
 0x258   :  { %v558_v19 = vmul.f32 0.25, %v326_v15 }
 0x259   :  { %v2543_v16 = vpop.f32.mrf.mxu1 }
 0x25a   :  { %v564_v29 = vsel %vm562_vm3, -1e+20, %v558_v19 }
 0x25b   :  { %v569_v33 = vsel %vm568_vm4, %v564_v29, -inf }
 0x2ca   :  { %v402_v18 = vpop.f32.mrf.mxu1 }
 0x2cb   :  { %v559_v20 = vmul.f32 0.25, %v402_v18 }
 0x2cc   :  { %v2548_v22 = vpop.f32.mrf.mxu1 }
 0x2cd   :  { %v565_v23 = vsel %vm562_vm3, -1e+20, %v559_v20 }
 0x2ce   :  { %v478_v24 = vpop.f32.mrf.mxu0  ;;  %v554_v25 = vpop.f32.mrf.mxu1  ;;  %v572_v26 = vsel %vm568_vm4, %v565_v23, -inf }
 0x2cf   :  { %v560_v27 = vmul.f32 0.25, %v478_v24  ;;  %v561_v28 = vmul.f32 0.25, %v554_v25  ;;  %573 = vmax.xlane.f32.xlu0 %v572_v26 }
 0x2d0   :  { %v2553_v30 = vpop.f32.mrf.mxu0  ;;  %v2558_v31 = vpop.f32.mrf.mxu1 }
 0x2d1   :  { %v567_v32 = vsel %vm563_vm5, -1e+20, %v561_v28  ;;  %v566_v35 = vsel %vm563_vm5, -1e+20, %v560_v27  ;;  %v927_v28 = vlaneseq  ;;  %v3197_v31 = vld [vmem:[#allocation13] sm:$0xff] }
 0x2d2   :  { %v578_v34 = vsel %vm568_vm4, %v567_v32, -inf  ;;  %v575_v36 = vsel %vm568_vm4, %v566_v35, -inf }
 0x2d3   :  { %570 = vmax.xlane.f32.xlu0 %v569_v33  ;;  %579 = vmax.xlane.f32.xlu1 %v578_v34 }
 0x2d7   :  { %576 = vmax.xlane.f32.xlu0 %v575_v36 }
 0x358   :  { %v574_v37 = vpop.xlane.xlu0 %573 }
 0x359   :  { %v582_v38 = vsub.f32 %v565_v23, %v574_v37 }
 0x35b   :  { %v587_v39 = vmul.f32 1.442695, %v582_v38 }
 0x35c   :  { %v580_v40 = vpop.xlane.xlu1 %579  ;;  %v571_v47 = vpop.xlane.xlu0 %570 }
 0x35d   :  { %2740 = vpow2.f32 %v587_v39  ;;  %v584_v41 = vsub.f32 %v567_v32, %v580_v40  ;;  %v581_v48 = vsub.f32 %v564_v29, %v571_v47  ;;  %v3194_v29 = vshrl.u32 %v927_v28, 7 }
 0x35f   :  { %v591_v42 = vmul.f32 1.442695, %v584_v41  ;;  %v585_v50 = vmul.f32 1.442695, %v581_v48  ;;  %v929_v30 = vsub.s32 0, %v3194_v29  ;;  %v3206_v41 = vld [vmem:[#allocation11 + $0x50] sm:$0xff] }
 0x360   :  { %v577_v49 = vpop.xlane.xlu0 %576 }
 0x361   :  { %2742 = vpow2.f32 %v591_v42  ;;  %v583_v51 = vsub.f32 %v566_v35, %v577_v49  ;;  %v930_v32 = vrot.slane %v3197_v31, %v929_v30  ;;  %v3211_v42 = vld [vmem:[#allocation11 + $0x20] sm:$0xff] }
 0x362   :  { %2744 = vpow2.f32 %v585_v50 }
 0x363   :  { %v589_v52 = vmul.f32 1.442695, %v583_v51 }
 0x365   :  { %2746 = vpow2.f32 %v589_v52 }
 0x36a   :  { %v2741_v43 = vpop.eup %2740 }
 0x36b   :  { %v596_v44 = vsel %vm568_vm4, %v2741_v43, 0.0 }
 0x36c   :  { %597 = vadd.xlane.f32.xlu1 %v596_v44 }
 0x36e   :  { %v2743_v45 = vpop.eup %2742 }
 0x36f   :  { %v602_v46 = vsel %vm568_vm4, %v2743_v45, 0.0  ;;  %v2745_v53 = vpop.eup %2744 }
 0x370   :  { %603 = vadd.xlane.f32.xlu0 %v602_v46  ;;  %v593_v54 = vsel %vm568_vm4, %v2745_v53, 0.0 }
 0x372   :  { %v2747_v55 = vpop.eup %2746 }
 0x373   :  { %v599_v56 = vsel %vm568_vm4, %v2747_v55, 0.0 }
 0x37d   :  { %689 = vrot.lane.b32.xlu1 %v3120_v10, %s2991_s19 }
 0x386   :  { %841 = vrot.lane.b32.xlu0 %v3128_v11, %s2991_s19 }
 0x3a1   :  { %594 = vadd.xlane.f32.xlu1 %v593_v54  ;;  %v159_v54 = vld [vmem:[#allocation7] sm:$0xff] }
 0x3a5   :  { %600 = vadd.xlane.f32.xlu0 %v599_v56 }
 0x3b2   :  { %613 = vrot.lane.b32.xlu1 %v3112_v8, %s2991_s19 }
 0x3b6   :  { %941 = vrot.lane.b32.xlu1 %v3080_v0, %s2992_s1 }
 0x3ba   :  { %939 = vrot.lane.b32.xlu1 %v3082_v1, %s2992_s1 }
 0x3bb   :  { %765 = vrot.lane.b32.xlu0 %v3110_v7, %s2991_s19 }
 0x3bf   :  { %937 = vrot.lane.b32.xlu0 %v3088_v3, %s2992_s1 }
 0x3c3   :  { %935 = vrot.lane.b32.xlu0 %v3094_v4, %s2992_s1 }
 0x3f5   :  { %v598_v57 = vpop.xlane.xlu1 %597 }
 0x3f6   :  { %2748 = vrcp.f32 %v598_v57 }
 0x3f9   :  { %v690_v58 = vpop.permute.xlu1 %689  ;;  %v604_v59 = vpop.xlane.xlu0 %603 }
 0x3fa   :  { %2750 = vrcp.f32 %v604_v59  ;;  %2565 = vmatpush3.msra.mxu1 %v690_v58 }
 0x3fb   :  { %2574 = vmatprep.subr.mxu1 %v2987_v6 }
 0x3fd   :  { %v842_v62 = vpop.permute.xlu0 %841 }
 0x403   :  { %v2749_v60 = vpop.eup %2748 }
 0x404   :  { %v610_v61 = vmul.f32 %v2749_v60, %v2741_v43  ;;  %v3213_v43 = vld [vmem:[#allocation11 + $0x38] sm:$0xff] }
 0x406   :  { %2567 = vmatmul.mubr.msk.f32.vlgmr.msra.gmra.mxu1 %vm568_vm4, %v610_v61 }
 0x407   :  { %v2751_v63 = vpop.eup %2750  ;;  %2575 = vmatpush3.msra.mxu1 %v842_v62  ;;  %2576 = vmatprep.mubr.msk.f32.mxu1 %vm2988_vm1, %v2987_v6 }
 0x408   :  { %v612_v0 = vmul.f32 %v2751_v63, %v2743_v45 }
 0x40a   :  { %2577 = vmatmul.mubr.msk.f32.vlgmr.msra.gmra.mxu1 %vm568_vm4, %v612_v0  ;;  %v160_v0 = vld [vmem:[#allocation7 + $0x8] sm:$0xff] }
 0x42a   :  { %v595_v1 = vpop.xlane.xlu1 %594 }
 0x42b   :  { %2752 = vrcp.f32 %v595_v1  ;;  %v1059_v1 = vsub.s32 1, %v3194_v29 }
 0x42e   :  { %v614_v3 = vpop.permute.xlu1 %613  ;;  %v601_v4 = vpop.xlane.xlu0 %600 }
 0x42f   :  { %2754 = vrcp.f32 %v601_v4  ;;  %2560 = vmatpush3.msra.mxu0 %v614_v3 }
 0x430   :  { %2569 = vmatprep.subr.mxu0 %v2987_v6 }
 0x432   :  { %v766_v9 = vpop.permute.xlu0 %765  ;;  %v942_v12 = vpop.permute.xlu1 %941 }
 0x433   :  { %2579 = vmatprep.subr.mxu1 %v942_v12 }
 0x434   :  { %2580 = vmatpush3.msra.mxu1 %v942_v12 }
 0x436   :  { %v940_v13 = vpop.permute.xlu1 %939  ;;  %v938_v14 = vpop.permute.xlu0 %937 }
 0x437   :  { %2581 = vmatprep.subr.mxu1 %v940_v13 }
 0x438   :  { %v2753_v7 = vpop.eup %2752  ;;  %2582 = vmatpush3.msra.mxu1 %v940_v13 }
 0x439   :  { %v609_v8 = vmul.f32 %v2753_v7, %v2745_v53  ;;  %2583 = vmatprep.subr.mxu1 %v938_v14  ;;  %v1060_v7 = vrot.slane %v3197_v31, %v1059_v1 }
 0x43a   :  { %2584 = vmatpush3.msra.mxu1 %v938_v14  ;;  %v936_v15 = vpop.permute.xlu0 %935 }
 0x43b   :  { %2562 = vmatmul.mubr.msk.f32.vlgmr.msra.gmra.mxu0 %vm568_vm4, %v609_v8  ;;  %2585 = vmatprep.subr.mxu1 %v936_v15  ;;  %v1065_v8 = vsub.s32 2, %v3194_v29 }
 0x43c   :  { %v2755_v10 = vpop.eup %2754  ;;  %2570 = vmatpush3.msra.mxu0 %v766_v9  ;;  %2571 = vmatprep.mubr.msk.f32.mxu0 %vm2988_vm1, %v2987_v6 }
 0x43d   :  { %v611_v11 = vmul.f32 %v2755_v10, %v2747_v55  ;;  %2586 = vmatpush3.msra.mxu1 %v936_v15  ;;  %v1066_v12 = vrot.slane %v3197_v31, %v1065_v8 }
 0x43e   :  { %2590 = vmatprep.subr.mxu1 %v3206_v41 }
 0x43f   :  { %2572 = vmatmul.mubr.msk.f32.vlgmr.msra.gmra.mxu0 %vm568_vm4, %v611_v11 }
 0x440   :  { %2609 = vmatprep.mubr.msk.f32.mxu0 %vm165_vm0, %v159_v54 }
 0x4c6   :  { %v761_v16 = vpop.f32.mrf.mxu1 }
 0x4c7   :  { %918 = vrot.lane.b32.xlu1 %v761_v16, %s2993_s20 }
 0x4c8   :  { %v2568_v17 = vpop.f32.mrf.mxu1 }
 0x4ca   :  { %v913_v18 = vpop.f32.mrf.mxu1 }
 0x4cb   :  { %923 = vrot.lane.b32.xlu1 %v913_v18, %s2993_s20 }
 0x4cc   :  { %v2578_v19 = vpop.f32.mrf.mxu1 }
 0x4fb   :  { %v685_v20 = vpop.f32.mrf.mxu0 }
 0x4fd   :  { %v2563_v21 = vpop.f32.mrf.mxu0 }
 0x4fe   :  { %v158_v21 = vld [vmem:[#allocation5 + $0x8] sm:$0xff] }
 0x4ff   :  { %v837_v22 = vpop.f32.mrf.mxu0 }
 0x501   :  { %v2573_v23 = vpop.f32.mrf.mxu0 }
 0x539   :  { %v919_v24 = vpop.permute.xlu1 %918 }
 0x53a   :  { %v921_v25 = vsel %vm255_vm2, %v685_v20, %v919_v24  ;;  %v157_v20 = vld [vmem:[#allocation5] sm:$0xff] }
 0x53b   :  { %2587 = vmatprep.mubr.msk.f32.mxu1 %vm165_vm0, %v921_v25 }
 0x53d   :  { %v924_v26 = vpop.permute.xlu1 %923 }
 0x53e   :  { %v926_v27 = vsel %vm255_vm2, %v837_v22, %v924_v26 }
 0x53f   :  { %2588 = vmatmul.mubr.msk.f32.vlgmr.msra.gmra.mxu1 %vm165_vm0, %v926_v27 }
 0x540   :  { %2591 = vmatpush3.msra.mxu1 %v3206_v41 }
 0x541   :  { %2592 = vmatprep.subr.mxu1 %v3213_v43 }
 0x542   :  { %2593 = vmatpush3.msra.mxu1 %v3213_v43 }
 0x543   :  { %2594 = vmatprep.subr.mxu1 %v3211_v42 }
 0x544   :  { %2595 = vmatpush3.msra.mxu1 %v3211_v42 }
 0x5ff   :  { %v2589_v33 = vpop.f32.mrf.mxu1 }
 0x600   :  { %v1025_v34 = vadd.f32 %v2589_v33, %v930_v32 }
 0x601   :  { %v1019_v35 = vpop.f32.mrf.mxu1 }
 0x602   :  { %v1020_v36 = vadd.f32 %v1019_v35, %v930_v32  ;;  %v1029_v37 = vadd.f32 %v1025_v34, %v3098_v5 }
 0x604   :  { %v1033_v38 = vsel %vm165_vm0, %v1029_v37, 0.0  ;;  %v1028_v39 = vadd.f32 %v1020_v36, %v3085_v2  ;;  %v3222_v2 = vld [vmem:[#allocation11 + $0x8] sm:$0xff] }
 0x605   :  { %1034 = vadd.xlane.f32.xlu1 %v1033_v38  ;;  %2596 = vmatprep.subr.mxu1 %v3222_v2 }
 0x606   :  { %v1030_v40 = vsel %vm165_vm0, %v1028_v39, 0.0  ;;  %2597 = vmatpush3.msra.mxu1 %v3222_v2 }
 0x607   :  { %1031 = vadd.xlane.f32.xlu0 %v1030_v40 }
 0x616   :  { %1160 = vrot.lane.b32.xlu1 %v3206_v41, %s2989_s4 }
 0x61a   :  { %1156 = vrot.lane.b32.xlu1 %v3211_v42, %s2989_s4 }
 0x61e   :  { %1154 = vrot.lane.b32.xlu1 %v3222_v2, %s2989_s4 }
 0x622   :  { %1251 = vrot.lane.b32.xlu1 %v3213_v43, %s2991_s19 }
 0x626   :  { %1247 = vrot.lane.b32.xlu1 %v3222_v2, %s2991_s19 }
 0x68e   :  { %v1035_v5 = vpop.xlane.xlu1 %1034 }
 0x68f   :  { %v1038_v44 = vmul.f32 0.03125, %v1035_v5 }
 0x690   :  { %v1032_v45 = vpop.xlane.xlu0 %1031 }
 0x691   :  { %v1040_v46 = vsub.f32 %v1029_v37, %v1038_v44  ;;  %v1037_v47 = vmul.f32 0.03125, %v1032_v45 }
 0x692   :  { %v1161_v53 = vpop.permute.xlu1 %1160 }
 0x693   :  { %v1039_v48 = vsub.f32 %v1028_v39, %v1037_v47  ;;  %v1042_v49 = vmul.f32 %v1040_v46, %v1040_v46  ;;  %2601 = vmatprep.subr.mxu0 %v1161_v53  ;;  %v163_v39 = vld [vmem:[#allocation10] sm:$0xff]  ;;  %v164_v47 = vld [vmem:[#allocation10 + $0x8] sm:$0xff] }
 0x694   :  { %2602 = vmatpush3.msra.mxu0 %v1161_v53  ;;  %vm1660_vm6 = vcmp.eq.f32.partialorder %v163_v39, 0.0  ;;  %vm1661_vm7 = vcmp.eq.f32.partialorder %v164_v47, 0.0 }
 0x695   :  { %v1046_v50 = vsel %vm165_vm0, %v1042_v49, 0.0  ;;  %v1041_v51 = vmul.f32 %v1039_v48, %v1039_v48 }
 0x696   :  { %1047 = vadd.xlane.f32.xlu0 %v1046_v50  ;;  %v1157_v59 = vpop.permute.xlu1 %1156 }
 0x697   :  { %v1043_v52 = vsel %vm165_vm0, %v1041_v51, 0.0 }
 0x69a   :  { %1044 = vadd.xlane.f32.xlu0 %v1043_v52  ;;  %v1155_v63 = vpop.permute.xlu1 %1154 }
 0x69e   :  { %v1252_v17 = vpop.permute.xlu1 %1251 }
 0x6a2   :  { %v1248_v19 = vpop.permute.xlu1 %1247 }
 0x6b0   :  { %1158 = vrot.lane.b32.xlu0 %v3213_v43, %s2989_s4 }
 0x6b4   :  { %1253 = vrot.lane.b32.xlu0 %v3206_v41, %s2991_s19 }
 0x6b8   :  { %1249 = vrot.lane.b32.xlu0 %v3211_v42, %s2991_s19 }
 0x71f   :  { %v1048_v55 = vpop.xlane.xlu0 %1047 }
 0x720   :  { %v1050_v56 = vmul.f32 0.03125, %v1048_v55 }
 0x722   :  { %v1052_v57 = vadd.f32 1e-05, %v1050_v56 }
 0x723   :  { %v1045_v58 = vpop.xlane.xlu0 %1044 }
 0x724   :  { %2756 = vrsqrt.f32 %v1052_v57  ;;  %v1049_v60 = vmul.f32 0.03125, %v1045_v58 }
 0x726   :  { %v1051_v61 = vadd.f32 1e-05, %v1049_v60 }
 0x727   :  { %v1159_v62 = vpop.permute.xlu0 %1158 }
 0x728   :  { %2758 = vrsqrt.f32 %v1051_v61  ;;  %2603 = vmatprep.subr.mxu0 %v1159_v62 }
 0x729   :  { %2604 = vmatpush3.msra.mxu0 %v1159_v62 }
 0x72a   :  { %2605 = vmatprep.subr.mxu0 %v1157_v59 }
 0x72b   :  { %2606 = vmatpush3.msra.mxu0 %v1157_v59  ;;  %v1254_v16 = vpop.permute.xlu0 %1253 }
 0x72c   :  { %2607 = vmatprep.subr.mxu0 %v1155_v63  ;;  %2612 = vmatprep.subr.mxu1 %v1254_v16 }
 0x72d   :  { %2608 = vmatpush3.msra.mxu0 %v1155_v63 }
 0x72e   :  { %2610 = vmatmul.mubr.msk.f32.vlgmr.msra.gmra.mxu0 %vm165_vm0, %v160_v0  ;;  %2623 = vmatprep.subr.mxu0 %v2987_v6 }
 0x72f   :  { %2625 = vmatprep.mubr.msk.f32.mxu0 %vm2988_vm1, %v2987_v6  ;;  %v1250_v18 = vpop.permute.xlu0 %1249 }
 0x731   :  { %v2757_v3 = vpop.eup %2756 }
 0x732   :  { %v1056_v4 = vmul.f32 %v2757_v3, %v1040_v46 }
 0x734   :  { %v1062_v11 = vmul.f32 %v1060_v7, %v1056_v4 }
 0x735   :  { %v2759_v9 = vpop.eup %2758 }
 0x736   :  { %v1055_v10 = vmul.f32 %v2759_v9, %v1039_v48  ;;  %v3253_v15 = vadd.f32 %v1066_v12, %v1062_v11 }
 0x738   :  { %v1061_v13 = vmul.f32 %v1060_v7, %v1055_v10 }
 0x73a   :  { %v3251_v14 = vadd.f32 %v1066_v12, %v1061_v13 }
 0x73c   :  { %2598 = vmatprep.mubr.msk.f32.mxu1 %vm165_vm0, %v3251_v14 }
 0x73d   :  { %2599 = vmatmul.mubr.msk.f32.vlgmr.msra.gmra.mxu1 %vm165_vm0, %v3253_v15 }
 0x73e   :  { %2613 = vmatpush3.msra.mxu1 %v1254_v16  ;;  %2620 = vmatprep.mubr.msk.f32.mxu1 %vm165_vm0, %v157_v20 }
 0x73f   :  { %2614 = vmatprep.subr.mxu1 %v1252_v17 }
 0x740   :  { %2615 = vmatpush3.msra.mxu1 %v1252_v17 }
 0x741   :  { %2616 = vmatprep.subr.mxu1 %v1250_v18 }
 0x742   :  { %2617 = vmatpush3.msra.mxu1 %v1250_v18 }
 0x743   :  { %2618 = vmatprep.subr.mxu1 %v1248_v19 }
 0x744   :  { %2619 = vmatpush3.msra.mxu1 %v1248_v19 }
 0x745   :  { %2628 = vmatprep.subr.mxu1 %v2987_v6  ;;  %2621 = vmatmul.mubr.msk.f32.vlgmr.msra.gmra.mxu1 %vm165_vm0, %v158_v21 }
 0x746   :  { %2630 = vmatprep.mubr.msk.f32.mxu1 %vm2988_vm1, %v2987_v6 }
 0x7ee   :  { %v2611_v22 = vpop.f32.mrf.mxu0 }
 0x7f0   :  { %v1238_v23 = vpop.f32.mrf.mxu0 }
 0x7f1   :  { %1347 = vrot.lane.b32.xlu0 %v1238_v23, %s2990_s6  ;;  %2624 = vmatpush3.xpose.msk.msra.mxu0 %vm255_vm2, %v1238_v23 }
 0x7f2   :  { %2633 = vmatprep.subr.mxu0 %v2987_v6 }
 0x7f5   :  { %1350 = vrot.lane.b32.xlu0 %v2611_v22, %s2990_s6 }
 0x7fd   :  { %v2600_v24 = vpop.f32.mrf.mxu1 }
 0x7ff   :  { %v1141_v25 = vpop.f32.mrf.mxu1 }
 0x800   :  { %1341 = vrot.lane.b32.xlu1 %v1141_v25, %s2990_s6  ;;  %2626 = vmatmul.mubr.msk.f32.vlgmr.msra.gmra.mxu0 %vm255_vm2, %v1141_v25 }
 0x801   :  { %2634 = vmatpush3.xpose.msk.msra.mxu0 %vm255_vm2, %v2611_v22  ;;  %2635 = vmatprep.mubr.msk.f32.mxu0 %vm2988_vm1, %v2987_v6 }
 0x802   :  { %2643 = vmatprep.subr.mxu0 %v2987_v6 }
 0x804   :  { %1344 = vrot.lane.b32.xlu1 %v2600_v24, %s2990_s6  ;;  %2636 = vmatmul.mubr.msk.f32.vlgmr.msra.gmra.mxu0 %vm255_vm2, %v2600_v24 }
 0x805   :  { %2645 = vmatprep.mubr.msk.f32.mxu0 %vm2988_vm1, %v2987_v6  ;;  %v3288_v33 = vpop.f32.mrf.mxu1 }
 0x807   :  { %v1331_v34 = vpop.f32.mrf.mxu1 }
 0x808   :  { %2644 = vmatpush3.msra.mxu0 %v1331_v34 }
 0x809   :  { %2653 = vmatprep.subr.mxu0 %v2987_v6 }
 0x863   :  { %v1348_v26 = vpop.permute.xlu0 %1347 }
 0x864   :  { %2629 = vmatpush3.xpose.msk.msra.mxu1 %vm255_vm2, %v1348_v26 }
 0x865   :  { %2638 = vmatprep.subr.mxu1 %v2987_v6 }
 0x867   :  { %v1351_v28 = vpop.permute.xlu0 %1350 }
 0x872   :  { %v1342_v27 = vpop.permute.xlu1 %1341 }
 0x873   :  { %2631 = vmatmul.mubr.msk.f32.vlgmr.msra.gmra.mxu1 %vm255_vm2, %v1342_v27 }
 0x874   :  { %2639 = vmatpush3.xpose.msk.msra.mxu1 %vm255_vm2, %v1351_v28  ;;  %2640 = vmatprep.mubr.msk.f32.mxu1 %vm2988_vm1, %v2987_v6 }
 0x875   :  { %2648 = vmatprep.subr.mxu1 %v2987_v6 }
 0x876   :  { %v1345_v32 = vpop.permute.xlu1 %1344 }
 0x877   :  { %2641 = vmatmul.mubr.msk.f32.vlgmr.msra.gmra.mxu1 %vm255_vm2, %v1345_v32 }
 0x878   :  { %2650 = vmatprep.mubr.msk.f32.mxu1 %vm2988_vm1, %v2987_v6 }
 0x8c0   :  { %v1430_v35 = vpop.f32.mrf.mxu0 }
 0x8c1   :  { %v1656_v5 = vmul.f32 0.25, %v1430_v35 }
 0x8c2   :  { %v2627_v36 = vpop.f32.mrf.mxu0 }
 0x8c3   :  { %v1662_v52 = vsel %vm1660_vm6, -1e+20, %v1656_v5 }
 0x8c4   :  { %v1578_v37 = vpop.f32.mrf.mxu0  ;;  %v1666_v55 = vsel %vm568_vm4, %v1662_v52, -inf }
 0x8c5   :  { %v1658_v50 = vmul.f32 0.25, %v1578_v37 }
 0x8c6   :  { %v2637_v38 = vpop.f32.mrf.mxu0 }
 0x8c7   :  { %v1664_v57 = vsel %vm1661_vm7, -1e+20, %v1658_v50 }
 0x8c8   :  { %v1672_v58 = vsel %vm568_vm4, %v1664_v57, -inf }
 0x933   :  { %v1504_v40 = vpop.f32.mrf.mxu1 }
 0x934   :  { %v1657_v44 = vmul.f32 0.25, %v1504_v40 }
 0x935   :  { %v2632_v45 = vpop.f32.mrf.mxu1 }
 0x936   :  { %v1663_v46 = vsel %vm1660_vm6, -1e+20, %v1657_v44 }
 0x937   :  { %v1652_v48 = vpop.f32.mrf.mxu1  ;;  %v1669_v49 = vsel %vm568_vm4, %v1663_v46, -inf }
 0x938   :  { %v1659_v51 = vmul.f32 0.25, %v1652_v48  ;;  %1670 = vmax.xlane.f32.xlu0 %v1669_v49 }
 0x939   :  { %v2642_v53 = vpop.f32.mrf.mxu1 }
 0x93a   :  { %v1665_v54 = vsel %vm1661_vm7, -1e+20, %v1659_v51  ;;  %v2014_v51 = vsub.s32 3, %v3194_v29 }
 0x93b   :  { %v1675_v56 = vsel %vm568_vm4, %v1665_v54, -inf }
 0x93c   :  { %1667 = vmax.xlane.f32.xlu0 %v1666_v55  ;;  %1676 = vmax.xlane.f32.xlu1 %v1675_v56 }
 0x940   :  { %1673 = vmax.xlane.f32.xlu0 %v1672_v58 }
 0x9c1   :  { %v1671_v59 = vpop.xlane.xlu0 %1670 }
 0x9c2   :  { %v1679_v60 = vsub.f32 %v1663_v46, %v1671_v59 }
 0x9c4   :  { %v1684_v61 = vmul.f32 1.442695, %v1679_v60 }
 0x9c5   :  { %v1677_v62 = vpop.xlane.xlu1 %1676  ;;  %v1668_v9 = vpop.xlane.xlu0 %1667 }
 0x9c6   :  { %2760 = vpow2.f32 %v1684_v61  ;;  %v1681_v63 = vsub.f32 %v1665_v54, %v1677_v62  ;;  %v1678_v10 = vsub.f32 %v1662_v52, %v1668_v9  ;;  %v2015_v52 = vrot.slane %v3197_v31, %v2014_v51  ;;  %v136_v9 = vld [vmem:[#allocation11 + $0x58] sm:$0xff] }
 0x9c8   :  { %v1688_v0 = vmul.f32 1.442695, %v1681_v63  ;;  %v1682_v12 = vmul.f32 1.442695, %v1678_v10  ;;  %v133_v10 = vld [vmem:[#allocation11 + $0x40] sm:$0xff] }
 0x9c9   :  { %v1674_v11 = vpop.xlane.xlu0 %1673 }
 0x9ca   :  { %2762 = vpow2.f32 %v1688_v0  ;;  %v1680_v13 = vsub.f32 %v1664_v57, %v1674_v11  ;;  %v130_v11 = vld [vmem:[#allocation11 + $0x28] sm:$0xff] }
 0x9cb   :  { %2764 = vpow2.f32 %v1682_v12  ;;  %v127_v12 = vld [vmem:[#allocation11 + $0x10] sm:$0xff] }
 0x9cc   :  { %v1686_v16 = vmul.f32 1.442695, %v1680_v13  ;;  %v154_v13 = vld [vmem:[#allocation13 + $0x88] sm:$0xff] }
 0x9ce   :  { %2766 = vpow2.f32 %v1686_v16  ;;  %v153_v16 = vld [vmem:[#allocation13 + $0x80] sm:$0xff] }
 0x9d3   :  { %v2761_v3 = vpop.eup %2760 }
 0x9d4   :  { %v1693_v4 = vsel %vm568_vm4, %v2761_v3, 0.0 }
 0x9d5   :  { %1694 = vadd.xlane.f32.xlu1 %v1693_v4 }
 0x9d7   :  { %v2763_v7 = vpop.eup %2762 }
 0x9d8   :  { %v1699_v8 = vsel %vm568_vm4, %v2763_v7, 0.0  ;;  %v2765_v17 = vpop.eup %2764 }
 0x9d9   :  { %1700 = vadd.xlane.f32.xlu0 %v1699_v8  ;;  %v1690_v18 = vsel %vm568_vm4, %v2765_v17, 0.0 }
 0x9db   :  { %v2767_v19 = vpop.eup %2766 }
 0x9dc   :  { %v1696_v20 = vsel %vm568_vm4, %v2767_v19, 0.0 }
 0x9e6   :  { %1353 = vrot.lane.b32.xlu1 %v1331_v34, %s2990_s6 }
 0x9ef   :  { %1357 = vrot.lane.b32.xlu0 %v3288_v33, %s2990_s6 }
 0xa0a   :  { %1691 = vadd.xlane.f32.xlu1 %v1690_v18  ;;  %v151_v18 = vld [vmem:[#allocation13 + $0x70] sm:$0xff] }
 0xa0e   :  { %1697 = vadd.xlane.f32.xlu0 %v1696_v20  ;;  %v149_v20 = vld [vmem:[#allocation13 + $0x60] sm:$0xff] }
 0xa1b   :  { %2022 = vrot.lane.b32.xlu1 %v3206_v41, %s2992_s1 }
 0xa1f   :  { %2018 = vrot.lane.b32.xlu1 %v3211_v42, %s2992_s1 }
 0xa24   :  { %2020 = vrot.lane.b32.xlu0 %v3213_v43, %s2992_s1 }
 0xa28   :  { %2016 = vrot.lane.b32.xlu0 %v3222_v2, %s2992_s1 }
 0xa5e   :  { %v1695_v21 = vpop.xlane.xlu1 %1694 }
 0xa5f   :  { %2768 = vrcp.f32 %v1695_v21  ;;  %v148_v21 = vld [vmem:[#allocation13 + $0x58] sm:$0xff] }
 0xa62   :  { %v1354_v22 = vpop.permute.xlu1 %1353  ;;  %v1701_v23 = vpop.xlane.xlu0 %1700 }
 0xa63   :  { %2770 = vrcp.f32 %v1701_v23  ;;  %2649 = vmatpush3.msra.mxu1 %v1354_v22  ;;  %v147_v22 = vld [vmem:[#allocation13 + $0x50] sm:$0xff]  ;;  %v146_v23 = vld [vmem:[#allocation13 + $0x48] sm:$0xff] }
 0xa64   :  { %2658 = vmatprep.subr.mxu1 %v2987_v6 }
 0xa66   :  { %v1358_v41 = vpop.permute.xlu0 %1357 }
 0xa6c   :  { %v2769_v24 = vpop.eup %2768 }
 0xa6d   :  { %v1707_v25 = vmul.f32 %v2769_v24, %v2761_v3  ;;  %v145_v24 = vld [vmem:[#allocation13 + $0x40] sm:$0xff] }
 0xa6f   :  { %2651 = vmatmul.mubr.msk.f32.vlgmr.msra.gmra.mxu1 %vm568_vm4, %v1707_v25  ;;  %2359 = vst.msk [vmem:[#allocation15 + $0x8] sm:$0xff] %vm568_vm4, %v1707_v25  ;;  %v144_v25 = vld [vmem:[#allocation13 + $0x38] sm:$0xff] }
 0xa70   :  { %v2771_v42 = vpop.eup %2770  ;;  %2659 = vmatpush3.msra.mxu1 %v1358_v41  ;;  %2660 = vmatprep.mubr.msk.f32.mxu1 %vm2988_vm1, %v2987_v6  ;;  %v143_v41 = vld [vmem:[#allocation13 + $0x30] sm:$0xff] }
 0xa71   :  { %v1709_v43 = vmul.f32 %v2771_v42, %v2763_v7  ;;  %2674 = vmatprep.subr.mxu1 %v136_v9 }
 0xa73   :  { %2661 = vmatmul.mubr.msk.f32.vlgmr.msra.gmra.mxu1 %vm568_vm4, %v1709_v43  ;;  %2361 = vst.msk [vmem:[#allocation15 + $0x18] sm:$0xff] %vm568_vm4, %v1709_v43 }
 0xa74   :  { %2675 = vmatpush3.msra.mxu1 %v136_v9 }
 0xa75   :  { %2676 = vmatprep.subr.mxu1 %v133_v10 }
 0xa76   :  { %2677 = vmatpush3.msra.mxu1 %v133_v10 }
 0xa77   :  { %2678 = vmatprep.subr.mxu1 %v130_v11 }
 0xa78   :  { %2679 = vmatpush3.msra.mxu1 %v130_v11 }
 0xa79   :  { %2680 = vmatprep.subr.mxu1 %v127_v12 }
 0xa7a   :  { %2681 = vmatpush3.msra.mxu1 %v127_v12 }
 0xa93   :  { %v1692_v2 = vpop.xlane.xlu1 %1691 }
 0xa94   :  { %2772 = vrcp.f32 %v1692_v2 }
 0xa97   :  { %v1698_v26 = vpop.xlane.xlu0 %1697  ;;  %v2023_v35 = vpop.permute.xlu1 %2022 }
 0xa98   :  { %2774 = vrcp.f32 %v1698_v26 }
 0xa9b   :  { %v2021_v36 = vpop.permute.xlu0 %2020  ;;  %v2019_v37 = vpop.permute.xlu1 %2018 }
 0xa9f   :  { %v2017_v38 = vpop.permute.xlu0 %2016 }
 0xaa1   :  { %v2773_v27 = vpop.eup %2772 }
 0xaa2   :  { %v1706_v28 = vmul.f32 %v2773_v27, %v2765_v17  ;;  %v152_v17 = vld [vmem:[#allocation13 + $0x78] sm:$0xff] }
 0xaa4   :  { %2646 = vmatmul.mubr.msk.f32.vlgmr.msra.gmra.mxu0 %vm568_vm4, %v1706_v28  ;;  %2358 = vst.msk [vmem:[#allocation15] sm:$0xff] %vm568_vm4, %v1706_v28 }
 0xaa5   :  { %v2775_v32 = vpop.eup %2774  ;;  %2654 = vmatpush3.msra.mxu0 %v3288_v33  ;;  %2655 = vmatprep.mubr.msk.f32.mxu0 %vm2988_vm1, %v2987_v6 }
 0xaa6   :  { %v1708_v34 = vmul.f32 %v2775_v32, %v2767_v19  ;;  %2663 = vmatprep.subr.mxu0 %v2023_v35  ;;  %v150_v19 = vld [vmem:[#allocation13 + $0x68] sm:$0xff]  ;;  %v2139_v32 = vsub.s32 4, %v3194_v29 }
 0xaa8   :  { %2656 = vmatmul.mubr.msk.f32.vlgmr.msra.gmra.mxu0 %vm568_vm4, %v1708_v34  ;;  %2360 = vst.msk [vmem:[#allocation15 + $0x10] sm:$0xff] %vm568_vm4, %v1708_v34  ;;  %v2145_v34 = vsub.s32 5, %v3194_v29 }
 0xaa9   :  { %2664 = vmatpush3.msra.mxu0 %v2023_v35  ;;  %v2140_v35 = vrot.slane %v3197_v31, %v2139_v32 }
 0xaaa   :  { %2665 = vmatprep.subr.mxu0 %v2021_v36 }
 0xaab   :  { %2666 = vmatpush3.msra.mxu0 %v2021_v36 }
 0xaac   :  { %2667 = vmatprep.subr.mxu0 %v2019_v37 }
 0xaad   :  { %2668 = vmatpush3.msra.mxu0 %v2019_v37 }
 0xaae   :  { %2669 = vmatprep.subr.mxu0 %v2017_v38 }
 0xaaf   :  { %2670 = vmatpush3.msra.mxu0 %v2017_v38  ;;  %v2146_v38 = vrot.slane %v3197_v31, %v2145_v34 }
 0xab0   :  { %2685 = vmatprep.subr.mxu0 %v154_v13 }
 0xb2f   :  { %v1852_v33 = vpop.f32.mrf.mxu1 }
 0xb30   :  { %2003 = vrot.lane.b32.xlu1 %v1852_v33, %s2993_s20 }
 0xb31   :  { %v2652_v6 = vpop.f32.mrf.mxu1 }
 0xb33   :  { %v1998_v39 = vpop.f32.mrf.mxu1 }
 0xb34   :  { %2008 = vrot.lane.b32.xlu1 %v1998_v39, %s2993_s20 }
 0xb35   :  { %v2662_v40 = vpop.f32.mrf.mxu1 }
 0xb64   :  { %v1779_v5 = vpop.f32.mrf.mxu0 }
 0xb66   :  { %v2647_v44 = vpop.f32.mrf.mxu0 }
 0xb68   :  { %v1925_v45 = vpop.f32.mrf.mxu0 }
 0xb6a   :  { %v2657_v46 = vpop.f32.mrf.mxu0 }
 0xb6b   :  { %v141_v46 = vld [vmem:[#allocation13 + $0x20] sm:$0xff] }
 0xba2   :  { %v2004_v47 = vpop.permute.xlu1 %2003 }
 0xba3   :  { %v2006_v48 = vsel %vm255_vm2, %v1779_v5, %v2004_v47  ;;  %v140_v47 = vld [vmem:[#allocation13 + $0x18] sm:$0xff] }
 0xba4   :  { %2671 = vmatprep.mubr.msk.f32.mxu0 %vm165_vm0, %v2006_v48  ;;  %v139_v48 = vld [vmem:[#allocation13 + $0x10] sm:$0xff] }
 0xba6   :  { %v2009_v49 = vpop.permute.xlu1 %2008 }
 0xba7   :  { %v2011_v50 = vsel %vm255_vm2, %v1925_v45, %v2009_v49  ;;  %v142_v45 = vld [vmem:[#allocation13 + $0x28] sm:$0xff] }
 0xba8   :  { %2672 = vmatmul.mubr.msk.f32.vlgmr.msra.gmra.mxu0 %vm165_vm0, %v2011_v50  ;;  %v138_v49 = vld [vmem:[#allocation13 + $0x8] sm:$0xff] }
 0xba9   :  { %2686 = vmatpush3.msra.mxu0 %v154_v13  ;;  %v2152_v50 = vrot.slane %v138_v49, %v1059_v1 }
 0xbaa   :  { %2687 = vmatprep.subr.mxu0 %v153_v16 }
 0xbab   :  { %2688 = vmatpush3.msra.mxu0 %v153_v16 }
 0xbac   :  { %2689 = vmatprep.subr.mxu0 %v152_v17 }
 0xbad   :  { %2690 = vmatpush3.msra.mxu0 %v152_v17 }
 0xbae   :  { %2691 = vmatprep.subr.mxu0 %v151_v18 }
 0xbaf   :  { %2692 = vmatpush3.msra.mxu0 %v151_v18 }
 0xbb0   :  { %2693 = vmatprep.subr.mxu0 %v150_v19 }
 0xbb1   :  { %2694 = vmatpush3.msra.mxu0 %v150_v19 }
 0xbb2   :  { %2695 = vmatprep.subr.mxu0 %v149_v20 }
 0xbb3   :  { %2696 = vmatpush3.msra.mxu0 %v149_v20 }
 0xbb4   :  { %2697 = vmatprep.subr.mxu0 %v148_v21 }
 0xbb5   :  { %2698 = vmatpush3.msra.mxu0 %v148_v21 }
 0xbb6   :  { %2699 = vmatprep.subr.mxu0 %v147_v22 }
 0xbb7   :  { %2700 = vmatpush3.msra.mxu0 %v147_v22 }
 0xbb8   :  { %2701 = vmatprep.subr.mxu0 %v146_v23 }
 0xbb9   :  { %2702 = vmatpush3.msra.mxu0 %v146_v23 }
 0xbba   :  { %2703 = vmatprep.subr.mxu0 %v145_v24 }
 0xbbb   :  { %2704 = vmatpush3.msra.mxu0 %v145_v24 }
 0xbbc   :  { %2705 = vmatprep.subr.mxu0 %v144_v25 }
 0xbbd   :  { %2706 = vmatpush3.msra.mxu0 %v144_v25 }
 0xbbe   :  { %2707 = vmatprep.subr.mxu0 %v143_v41 }
 0xbbf   :  { %2708 = vmatpush3.msra.mxu0 %v143_v41 }
 0xbc0   :  { %2709 = vmatprep.subr.mxu0 %v142_v45 }
 0xbc1   :  { %2710 = vmatpush3.msra.mxu0 %v142_v45 }
 0xbc2   :  { %2711 = vmatprep.subr.mxu0 %v141_v46 }
 0xbc3   :  { %2712 = vmatpush3.msra.mxu0 %v141_v46 }
 0xbc4   :  { %2713 = vmatprep.subr.mxu0 %v140_v47 }
 0xbc5   :  { %2714 = vmatpush3.msra.mxu0 %v140_v47 }
 0xbc6   :  { %2715 = vmatprep.subr.mxu0 %v139_v48 }
 0xbc7   :  { %2716 = vmatpush3.msra.mxu0 %v139_v48 }
 0xc68   :  { %v2673_v53 = vpop.f32.mrf.mxu0 }
 0xc69   :  { %v2106_v54 = vadd.f32 %v2673_v53, %v2015_v52 }
 0xc6a   :  { %v2100_v55 = vpop.f32.mrf.mxu0 }
 0xc6b   :  { %v2101_v56 = vadd.f32 %v2100_v55, %v2015_v52  ;;  %v2110_v57 = vadd.f32 %v2106_v54, %v3253_v15 }
 0xc6d   :  { %v2114_v58 = vsel %vm165_vm0, %v2110_v57, 0.0  ;;  %v2109_v59 = vadd.f32 %v2101_v56, %v3251_v14 }
 0xc6e   :  { %2115 = vadd.xlane.f32.xlu1 %v2114_v58 }
 0xc6f   :  { %v2111_v60 = vsel %vm165_vm0, %v2109_v59, 0.0 }
 0xc70   :  { %2112 = vadd.xlane.f32.xlu0 %v2111_v60 }
 0xcf7   :  { %v2116_v61 = vpop.xlane.xlu1 %2115 }
 0xcf8   :  { %v2118_v62 = vmul.f32 0.03125, %v2116_v61 }
 0xcf9   :  { %v2113_v63 = vpop.xlane.xlu0 %2112 }
 0xcfa   :  { %v2117_v0 = vmul.f32 0.03125, %v2113_v63  ;;  %v3336_v3 = vsub.f32 %v2110_v57, %v2118_v62  ;;  %v2238_v57 = vsub.s32 6, %v3194_v29 }
 0xcfc   :  { %v3338_v4 = vsub.f32 %v2109_v59, %v2117_v0  ;;  %v2122_v14 = vmul.f32 %v3336_v3, %v3336_v3  ;;  %v2239_v58 = vrot.slane %v3197_v31, %v2238_v57 }
 0xcfe   :  { %v2121_v7 = vmul.f32 %v3338_v4, %v3338_v4  ;;  %v2126_v8 = vsel %vm165_vm0, %v2122_v14, 0.0 }
 0xd00   :  { %v2123_v15 = vsel %vm165_vm0, %v2121_v7, 0.0 }
 0xd01   :  { %2124 = vadd.xlane.f32.xlu0 %v2123_v15 }
 0xd05   :  { %2127 = vadd.xlane.f32.xlu0 %v2126_v8 }
 0xd8a   :  { %v2125_v42 = vpop.xlane.xlu0 %2124 }
 0xd8b   :  { %v2129_v43 = vmul.f32 0.03125, %v2125_v42 }
 0xd8d   :  { %v2131_v2 = vadd.f32 1e-05, %v2129_v43 }
 0xd8e   :  { %v2128_v26 = vpop.xlane.xlu0 %2127 }
 0xd8f   :  { %2776 = vrsqrt.f32 %v2131_v2  ;;  %v2130_v27 = vmul.f32 0.03125, %v2128_v26 }
 0xd91   :  { %v2132_v28 = vadd.f32 1e-05, %v2130_v27 }
 0xd93   :  { %2778 = vrsqrt.f32 %v2132_v28 }
 0xd9c   :  { %v2777_v36 = vpop.eup %2776 }
 0xd9d   :  { %v2135_v37 = vmul.f32 %v2777_v36, %v3338_v4 }
 0xd9f   :  { %v2141_v33 = vmul.f32 %v2140_v35, %v2135_v37 }
 0xda0   :  { %v2779_v6 = vpop.eup %2778 }
 0xda1   :  { %v2136_v39 = vmul.f32 %v2779_v6, %v3336_v3  ;;  %v2147_v40 = vadd.f32 %v2146_v38, %v2141_v33 }
 0xda3   :  { %v2142_v5 = vmul.f32 %v2140_v35, %v2136_v39  ;;  %2682 = vmatprep.mubr.msk.f32.mxu1 %vm165_vm0, %v2147_v40 }
 0xda5   :  { %v2148_v44 = vadd.f32 %v2146_v38, %v2142_v5 }
 0xda7   :  { %2683 = vmatmul.mubr.msk.f32.vlgmr.msra.gmra.mxu1 %vm165_vm0, %v2148_v44 }
 0xe67   :  { %v2684_v51 = vpop.f32.mrf.mxu1 }
 0xe68   :  { %v2231_v52 = vadd.f32 %v2684_v51, %v2152_v50 }
 0xe69   :  { %v2225_v53 = vpop.f32.mrf.mxu1 }
 0xe6a   :  { %v2226_v54 = vadd.f32 %v2225_v53, %v2152_v50  ;;  %v2235_v56 = vmax.f32 %v2231_v52, 0.0 }
 0xe6c   :  { %v2234_v55 = vmax.f32 %v2226_v54, 0.0 }
 0xe6e   :  { %2717 = vmatprep.mubr.f32.mxu0 %v2234_v55 }
 0xe6f   :  { %2718 = vmatmul.mubr.f32.vlgmr.msra.gmra.mxu0 %v2235_v56 }
 0xf2f   :  { %v2719_v59 = vpop.f32.mrf.mxu0 }
 0xf30   :  { %v2312_v60 = vadd.f32 %v2719_v59, %v2239_v58 }
 0xf31   :  { %v2306_v61 = vpop.f32.mrf.mxu0 }
 0xf32   :  { %v2307_v62 = vadd.f32 %v2306_v61, %v2239_v58  ;;  %v2316_v63 = vadd.f32 %v2312_v60, %v2148_v44 }
 0xf34   :  { %v2320_v0 = vsel %vm165_vm0, %v2316_v63, 0.0  ;;  %v2315_v1 = vadd.f32 %v2307_v62, %v2147_v40 }
 0xf35   :  { %2321 = vadd.xlane.f32.xlu0 %v2320_v0 }
 0xf36   :  { %v2317_v3 = vsel %vm165_vm0, %v2315_v1, 0.0 }
 0xf37   :  { %2318 = vadd.xlane.f32.xlu1 %v2317_v3 }
 0xfbe   :  { %v2322_v4 = vpop.xlane.xlu0 %2321 }
 0xfbf   :  { %v2324_v7 = vmul.f32 0.03125, %v2322_v4 }
 0xfc0   :  { %v2319_v15 = vpop.xlane.xlu1 %2318 }
 0xfc1   :  { %v2326_v14 = vsub.f32 %v2316_v63, %v2324_v7  ;;  %v2323_v8 = vmul.f32 0.03125, %v2319_v15 }
 0xfc3   :  { %v2325_v9 = vsub.f32 %v2315_v1, %v2323_v8  ;;  %v2328_v10 = vmul.f32 %v2326_v14, %v2326_v14 }
 0xfc5   :  { %v2332_v11 = vsel %vm165_vm0, %v2328_v10, 0.0  ;;  %v2327_v12 = vmul.f32 %v2325_v9, %v2325_v9 }
 0xfc6   :  { %2333 = vadd.xlane.f32.xlu0 %v2332_v11 }
 0xfc7   :  { %v2329_v13 = vsel %vm165_vm0, %v2327_v12, 0.0 }
 0xfc8   :  { %2330 = vadd.xlane.f32.xlu1 %v2329_v13 }
 0xfc9   :  { %2935 = shalt.err (!%p2932_p11)
}
 0xfca   :  { %2385 = dma.vmem_to_hbm [thread:$0]  %s2380_s22, 512, %s3388_s8, [#allocation16], %s2978_s10, %s2978_s10, %s2979_s11   ;;  %v2345_v22 = vsub.s32 7, %v3194_v29  ;;  %v2352_v25 = vrot.slane %v138_v49, %v929_v30 }
 0xfcb   :  { %s2995_s8 = smov [#allocation14]  }
 0xfcc   :  { %v2346_v23 = vrot.slane %v3197_v31, %v2345_v22  ;;  %s2367_s25 = sshll.u32 %s2995_s8, 4  ;;  %s2368_s25 = int_to_ptr.vmem [resolvable:$true] %s2367_s25 }
 0xfcd   :  { %s2944_s26 = scalar_lea.vmem %s2368_s25, 256  ;;  %p2949_p13 = scmp.lt.s32.totalorder %s2368_s25, %s2368_s25 }
 0xfce   :  { %p2945_p12 = scmp.ne.s32.totalorder %s2368_s25, %s2944_s26  ;;  %p2950_p0 = scmp.lt.s32.totalorder %s2944_s26, %s2944_s26 }
 0xfd0   :  { %p2951_p1 = por %p2950_p0, %p2949_p13 }
 0xfd2   :  { %p2952_p2 = pnand %p2951_p1, %p2945_p12 }
0x104f   :  { %v2334_v16 = vpop.xlane.xlu0 %2333 }
0x1050   :  { %v2336_v17 = vmul.f32 0.03125, %v2334_v16 }
0x1051   :  { %v2331_v18 = vpop.xlane.xlu1 %2330 }
0x1052   :  { %v2338_v19 = vadd.f32 1e-05, %v2336_v17  ;;  %v2335_v20 = vmul.f32 0.03125, %v2331_v18 }
0x1054   :  { %2780 = vrsqrt.f32 %v2338_v19  ;;  %v2337_v21 = vadd.f32 1e-05, %v2335_v20 }
0x1056   :  { %2782 = vrsqrt.f32 %v2337_v21 }
0x1061   :  { %v2781_v24 = vpop.eup %2780 }
0x1062   :  { %v2342_v41 = vmul.f32 %v2781_v24, %v2326_v14 }
0x1063   :  { %v2783_v42 = vpop.eup %2782 }
0x1064   :  { %v2341_v43 = vmul.f32 %v2783_v42, %v2325_v9  ;;  %v2348_v2 = vmul.f32 %v2346_v23, %v2342_v41 }
0x1066   :  { %v2347_v26 = vmul.f32 %v2346_v23, %v2341_v43  ;;  %v2354_v27 = vadd.f32 %v2352_v25, %v2348_v2 }
0x1068   :  { %v2353_v28 = vadd.f32 %v2352_v25, %v2347_v26  ;;  %2357 = vst.msk [vmem:[#allocation14 + $0x8] sm:$0xff] %vm165_vm0, %v2354_v27 }
0x106a   :  { %2355 = vst.msk [vmem:[#allocation14] sm:$0xff] %vm165_vm0, %v2353_v28 }
0x106b   :  { %2955 = shalt.err (!%p2952_p2)
}
0x106c   :  { %2373 = dma.vmem_to_hbm [thread:$0]  %s2368_s25, 256, %s3387_s7, [#allocation4], %s2978_s10, %s2978_s10, %s2979_s11  }
0x106d   :  { %2972 = dma.done.wait [#allocation4], 256  }
0x106e   :  { %2973 = vsyncadd [#allocation4], 4294967040 }
0x106f   :  { %2974 = dma.done.wait [#allocation16], 512  }
0x1070   :  { %2975 = vsyncadd [#allocation16], 4294966784 }
0x1071   :  { %2392 = vsyncpa [#allocation3], 1 }
0x1072   :  { %2393 = vsyncpa [#allocation6], 1 }
0x1073   :  { %2394 = vsyncpa [#allocation9], 1 }
0x1074   :  { %2395 = vsyncpa [#allocation12], 1 }
0x1075   :  { %2396 = vsyncpa [#allocation4], 1 }
0x1076   :  { %2397 = vsyncpa [#allocation16], 1 }

</bundles_post_ra>
